<compile_context>
chip_gen: v7x
topology: tpu7x:2x2x1
jax: 0.10.0
libtpu: 0.0.40
codegen_flags: <defaults>
</compile_context>

<pallas_src>
import functools

import jax
import jax.numpy as jnp
from jax import lax
from jax.experimental import pallas as pl
from jax.experimental.pallas import tpu as pltpu


# ---------------------------------------------------------------------------
# In-kernel helpers
# ---------------------------------------------------------------------------
def _conv3x3_im2col(x, w9_ref, b_ref, mask_ref, col_ref, *, W, L, relu):
    """3x3 / stride-1 / pad-1 conv; channels in sublanes, flat spatial in lanes.

    x        : (Cin, L) f32 value; lanes = B images of H*W pixels (+ masked pad).
    w9_ref   : (Cout, 9*Cin) bf16 ref, column = (ky*3+kx)*Cin + cin.
    b_ref    : (Cout, 1) f32 ref.
    mask_ref : (9, 1, L) f32 ref, precomputed 0/1 border masks (hoisted VPU work).
    col_ref  : (9*Cin_max, L_max) bf16 VMEM scratch; im2col streamed into it.
    Returns (Cout, L) f32.
    """
    cin = x.shape[0]
    for k in range(9):
        ky, kx = divmod(k, 3)
        dy, dx = ky - 1, kx - 1
        s = dy * W + dx                              # flattened-spatial source offset
        shifted = x if s == 0 else pltpu.roll(x, shift=(-s) % L, axis=1)
        tap = shifted * mask_ref[k]                  # (1, L) 0/1 mask broadcast
        col_ref[pl.ds(k * cin, cin), pl.ds(0, L)] = tap.astype(jnp.bfloat16)
    rhs = col_ref[pl.ds(0, 9 * cin), pl.ds(0, L)]    # (9*Cin, L) bf16 im2col
    out = jnp.dot(w9_ref[...], rhs, preferred_element_type=jnp.float32) + b_ref[...]
    if relu:
        out = jnp.maximum(out, 0.0)
    return out


def _autoencoder_kernel(x_ref,
                        w1_ref, b1_ref, w2_ref, b2_ref,
                        w3_ref, b3_ref, w4_ref, b4_ref,
                        sub_ref, up_ref, mfull_ref, mlat_ref,
                        o_ref, col_ref, *, W, Wl, L_img, L_lat):
    """B images per grid step; all activations stay in VMEM/registers."""
    x = x_ref[...]                                               # (Cin_pad, L_img) f32

    # ---- encoder -----------------------------------------------------------
    h1 = _conv3x3_im2col(x, w1_ref, b1_ref, mfull_ref, col_ref,
                         W=W, L=L_img, relu=True)
    zf = _conv3x3_im2col(h1, w2_ref, b2_ref, mfull_ref, col_ref,
                         W=W, L=L_img, relu=False)
    # stride-2 conv output == stride-1 output at even centres: bf16 0/1
    # selection matmul producing the lane-dense latent (z_pad, L_lat).
    z = jnp.dot(zf.astype(jnp.bfloat16), sub_ref[...],
                preferred_element_type=jnp.float32)

    # ---- decoder ------------------------------------------------------------
    h2 = _conv3x3_im2col(z, w3_ref, b3_ref, mlat_ref, col_ref,
                         W=Wl, L=L_lat, relu=True)
    # nearest x2 upsample fused as a bf16 0/1 selection matmul.
    up = jnp.dot(h2.astype(jnp.bfloat16), up_ref[...],
                 preferred_element_type=jnp.float32)
    out = _conv3x3_im2col(up, w4_ref, b4_ref, mfull_ref, col_ref,
                          W=W, L=L_img, relu=False)

    o_ref[...] = out.astype(o_ref.dtype)                         # lane-dense store


# ---------------------------------------------------------------------------
# Wrapper-side constant / weight preparation (layout plumbing lives here)
# ---------------------------------------------------------------------------
def _round_up(v, m):
    return (v + m - 1) // m * m


def _prep_conv(w, b, cin_pad, cout_pad):
    """(3,3,Cin,Cout) HWIO -> (Cout_pad, 9*Cin_pad) bf16; bias -> (Cout_pad,1) f32."""
    _, _, cin, cout = w.shape
    w = jnp.pad(w, ((0, 0), (0, 0), (0, cin_pad - cin), (0, cout_pad - cout)))
    b = jnp.pad(b, (0, cout_pad - cout))
    w9 = jnp.transpose(w, (3, 0, 1, 2)).reshape(cout_pad, 9 * cin_pad).astype(jnp.bfloat16)
    return w9, b.reshape(cout_pad, 1).astype(jnp.float32)


def _tap_masks(H, W, B, L):
    """(9,1,L) f32 0/1 masks; per-image coords via j % (H*W); pad lanes zeroed."""
    HW = H * W
    j = jnp.arange(L)
    jj = j % HW
    yy, xx = jj // W, jj % W
    in_img = j < B * HW
    rows = []
    for ky in range(3):
        for kx in range(3):
            dy, dx = ky - 1, kx - 1
            rows.append(in_img & (xx + dx >= 0) & (xx + dx < W)
                        & (yy + dy >= 0) & (yy + dy < H))
    return jnp.stack(rows).astype(jnp.float32).reshape(9, 1, L)


def _subsample_matrix(H, W, B, L_img, L_lat):
    """(L_img, L_lat) bf16: latent lane j picks the stride-2 centre of its image."""
    Hl, Wl = H // 2, W // 2
    HW, HlWl = H * W, Hl * Wl
    j = jnp.arange(L_lat)
    b, jj = j // HlWl, j % HlWl
    src = b * HW + (2 * (jj // Wl)) * W + 2 * (jj % Wl)
    i = jnp.arange(L_img)
    m = (i[:, None] == src[None, :]) & (j[None, :] < B * HlWl)
    return m.astype(jnp.bfloat16)


def _upsample_matrix(H, W, B, L_img, L_lat):
    """(L_lat, L_img) bf16: output lane j reads latent lane of its image at (y//2,x//2)."""
    Hl, Wl = H // 2, W // 2
    HW, HlWl = H * W, Hl * Wl
    j = jnp.arange(L_img)
    b, jj = j // HW, j % HW
    src = b * HlWl + (jj // W // 2) * Wl + (jj % W) // 2
    i = jnp.arange(L_lat)
    return (i[:, None] == src[None, :]).astype(jnp.bfloat16)


def _pick_lane_batch(n):
    """Images per grid step: <= 8 and keep >= 2 grid steps (v7x has 2 TCs)."""
    best = 1
    for b in range(1, min(8, n) + 1):
        if n % b == 0 and (n // b >= 2 or n == b == 1):
            best = b
    return best


# ---------------------------------------------------------------------------
# AutoEncoder forward (matches the PyTorch module semantics)
# ---------------------------------------------------------------------------
@jax.jit
def autoencoder_forward(params, img_nchw):
    """img_nchw: (N, C, H, W) like the PyTorch module.  Returns (recon_nchw, None)."""
    N, C, H, W = img_nchw.shape
    assert H % 2 == 0 and W % 2 == 0, "even spatial dims required (stride-2 / x2 upsample)"
    assert (H * W) % 128 == 0, "H*W must be a multiple of 128 for the lane-dense layout"
    HW = H * W
    Hl, Wl = H // 2, W // 2

    hidden = params["enc_conv1"][0].shape[-1]
    z_ch = params["enc_conv2"][0].shape[-1]

    c_pad = _round_up(C, 16)          # bf16 packs 16 sublanes per vreg
    h_pad = _round_up(hidden, 16)
    z_pad = _round_up(z_ch, 16)
    max_cin = max(c_pad, h_pad, z_pad)

    B = _pick_lane_batch(N)           # images packed along the lane axis per step
    L_img = B * HW
    L_lat = max(128, _round_up(B * Hl * Wl, 128))
    steps = N // B

    # Lane-dense input slab: (Cin_pad, N*HW), batch concatenated on lanes.
    x = img_nchw.reshape(N, C, HW)
    x = jnp.pad(x, ((0, 0), (0, c_pad - C), (0, 0)))
    x = jnp.transpose(x, (1, 0, 2)).reshape(c_pad, N * HW)

    w1, b1 = _prep_conv(*params["enc_conv1"], c_pad, h_pad)
    w2, b2 = _prep_conv(*params["enc_conv2"], h_pad, z_pad)
    w3, b3 = _prep_conv(*params["dec_conv1"], z_pad, h_pad)
    w4, b4 = _prep_conv(*params["dec_conv2"], h_pad, C)
    sub_m = _subsample_matrix(H, W, B, L_img, L_lat)
    up_m = _upsample_matrix(H, W, B, L_img, L_lat)
    m_full = _tap_masks(H, W, B, L_img)
    m_lat = _tap_masks(Hl, Wl, B, L_lat)

    kernel = functools.partial(_autoencoder_kernel,
                               W=W, Wl=Wl, L_img=L_img, L_lat=L_lat)

    def const_spec(a):
        nd = a.ndim
        return pl.BlockSpec(a.shape, lambda n, _nd=nd: (0,) * _nd)

    # Advisory cost hint for XLA scheduling around the custom call.
    conv_flops = (2 * N * HW * 9 * (c_pad * h_pad + h_pad * z_pad + h_pad * C)
                  + 2 * N * (HW // 4) * 9 * z_pad * h_pad)
    sel_flops = 2 * steps * (z_pad + h_pad) * L_img * L_lat
    const_bytes = (2 * (w1.size + w2.size + w3.size + w4.size + sub_m.size + up_m.size)
                   + 4 * (b1.size + b2.size + b3.size + b4.size + m_full.size + m_lat.size))
    bytes_accessed = 4 * c_pad * N * HW + 4 * C * N * HW + const_bytes

    recon_flat = pl.pallas_call(
        kernel,
        out_shape=jax.ShapeDtypeStruct((C, N * HW), img_nchw.dtype),
        grid_spec=pltpu.PrefetchScalarGridSpec(
            num_scalar_prefetch=0,
            grid=(steps,),
            in_specs=[
                pl.BlockSpec((c_pad, L_img), lambda n: (0, n)),
                const_spec(w1), const_spec(b1),
                const_spec(w2), const_spec(b2),
                const_spec(w3), const_spec(b3),
                const_spec(w4), const_spec(b4),
                const_spec(sub_m), const_spec(up_m),
                const_spec(m_full), const_spec(m_lat),
            ],
            out_specs=pl.BlockSpec((C, L_img), lambda n: (0, n)),
            scratch_shapes=[pltpu.VMEM((9 * max_cin, L_img), jnp.bfloat16)],
        ),
        compiler_params=pltpu.CompilerParams(
            dimension_semantics=("parallel",)),        # batch steps -> 2 TCs on v7x
        cost_estimate=pl.CostEstimate(
            flops=int(conv_flops + sel_flops),
            transcendentals=0,
            bytes_accessed=int(bytes_accessed)),
    )(x, w1, b1, w2, b2, w3, b3, w4, b4, sub_m, up_m, m_full, m_lat)

    recon = jnp.transpose(recon_flat.reshape(C, N, H, W), (1, 0, 2, 3))
    return recon, None


# ---------------------------------------------------------------------------
# Parameter construction (deterministic, PyTorch-default-like uniform init)
# ---------------------------------------------------------------------------
def _conv_params(key, cin, cout):
    kw, kb = jax.random.split(key)
    bound = 1.0 / jnp.sqrt(cin * 9.0)
    w = jax.random.uniform(kw, (3, 3, cin, cout), jnp.float32, -bound, bound)
    b = jax.random.uniform(kb, (cout,), jnp.float32, -bound, bound)
    return w, b


def init_autoencoder_params(key, img_channels, hidden, z_channels):
    k1, k2, k3, k4 = jax.random.split(key, 4)
    return {
        "enc_conv1": _conv_params(k1, img_channels, hidden),
        "enc_conv2": _conv_params(k2, hidden, z_channels),
        "dec_conv1": _conv_params(k3, z_channels, hidden),
        "dec_conv2": _conv_params(k4, hidden, img_channels),
    }


# ---------------------------------------------------------------------------
# Pure-JAX f32 reference (loose numerical sanity check; MXU operands are bf16)
# ---------------------------------------------------------------------------
def _reference_forward(params, img_nchw):
    def conv(x, w, b, stride):
        y = lax.conv_general_dilated(
            x, w, window_strides=(stride, stride), padding=((1, 1), (1, 1)),
            dimension_numbers=("NCHW", "HWIO", "NCHW"))
        return y + b.reshape(1, -1, 1, 1)

    w1, b1 = params["enc_conv1"]; w2, b2 = params["enc_conv2"]
    w3, b3 = params["dec_conv1"]; w4, b4 = params["dec_conv2"]
    h = jax.nn.relu(conv(img_nchw, w1, b1, 1))
    z = conv(h, w2, b2, 2)
    h = jax.nn.relu(conv(z, w3, b3, 1))
    h = jnp.repeat(jnp.repeat(h, 2, axis=2), 2, axis=3)
    return conv(h, w4, b4, 1)


if __name__ == "__main__":
    key = jax.random.PRNGKey(0)
    k_img, k_params = jax.random.split(key)

    # Small shapes consistent with the module: batch=2, img_channels=4, 16x16.
    N, C, H, W = 2, 4, 16, 16
    hidden = 16
    latent_dims = (8, H // 2, W // 2)  # (z_channels, z_height, z_width)

    img = jax.random.normal(k_img, (N, C, H, W), jnp.float32)
    params = init_autoencoder_params(k_params, C, hidden, latent_dims[0])

    recon, aux = autoencoder_forward(params, img)
    recon = jax.block_until_ready(recon)

    assert recon.shape == (N, C, H, W), recon.shape
    assert aux is None

    # Loose tolerance: kernel feeds the MXU bf16 operands (f32 accumulation).
    ref = _reference_forward(params, img)
    max_err = float(jnp.max(jnp.abs(recon - ref)))
    assert max_err < 5e-2, f"max abs error vs f32 reference: {max_err}"

    print("KERNEL_OK")
</pallas_src>

<mosaic_0001>
module attributes {stable_mosaic.version = 11 : i64} {
  func.func @_autoencoder_kernel(%arg0: i32, %arg1: memref<16x256xf32, #tpu.memory_space<vmem>>, %arg2: memref<16x144xbf16, #tpu.memory_space<vmem>>, %arg3: memref<16x1xf32, #tpu.memory_space<vmem>>, %arg4: memref<16x144xbf16, #tpu.memory_space<vmem>>, %arg5: memref<16x1xf32, #tpu.memory_space<vmem>>, %arg6: memref<16x144xbf16, #tpu.memory_space<vmem>>, %arg7: memref<16x1xf32, #tpu.memory_space<vmem>>, %arg8: memref<4x144xbf16, #tpu.memory_space<vmem>>, %arg9: memref<4x1xf32, #tpu.memory_space<vmem>>, %arg10: memref<256x128xbf16, #tpu.memory_space<vmem>>, %arg11: memref<128x256xbf16, #tpu.memory_space<vmem>>, %arg12: memref<9x1x256xf32, #tpu.memory_space<vmem>>, %arg13: memref<9x1x128xf32, #tpu.memory_space<vmem>>, %arg14: memref<4x256xf32, #tpu.memory_space<vmem>>, %arg15: memref<144x256xbf16, #tpu.memory_space<vmem>>) attributes {dimension_semantics = [#tpu.dimension_semantics<parallel>], iteration_bounds = array<i64: 2>, scalar_prefetch = 0 : i64, scratch_operands = 1 : i64, tpu.core_type = #tpu.core_type<tc>, window_params = [{transform_indices = @transform_0, window_bounds = array<i64: 16, 256>}, {pipeline_mode = #tpu.pipeline_mode<synchronous>, transform_indices = @transform_1, window_bounds = array<i64: 16, 144>}, {pipeline_mode = #tpu.pipeline_mode<synchronous>, transform_indices = @transform_2, window_bounds = array<i64: 16, 1>}, {pipeline_mode = #tpu.pipeline_mode<synchronous>, transform_indices = @transform_3, window_bounds = array<i64: 16, 144>}, {pipeline_mode = #tpu.pipeline_mode<synchronous>, transform_indices = @transform_4, window_bounds = array<i64: 16, 1>}, {pipeline_mode = #tpu.pipeline_mode<synchronous>, transform_indices = @transform_5, window_bounds = array<i64: 16, 144>}, {pipeline_mode = #tpu.pipeline_mode<synchronous>, transform_indices = @transform_6, window_bounds = array<i64: 16, 1>}, {pipeline_mode = #tpu.pipeline_mode<synchronous>, transform_indices = @transform_7, window_bounds = array<i64: 4, 144>}, {pipeline_mode = #tpu.pipeline_mode<synchronous>, transform_indices = @transform_8, window_bounds = array<i64: 4, 1>}, {pipeline_mode = #tpu.pipeline_mode<synchronous>, transform_indices = @transform_9, window_bounds = array<i64: 256, 128>}, {pipeline_mode = #tpu.pipeline_mode<synchronous>, transform_indices = @transform_10, window_bounds = array<i64: 128, 256>}, {pipeline_mode = #tpu.pipeline_mode<synchronous>, transform_indices = @transform_11, window_bounds = array<i64: 9, 1, 256>}, {pipeline_mode = #tpu.pipeline_mode<synchronous>, transform_indices = @transform_12, window_bounds = array<i64: 9, 1, 128>}, {transform_indices = @transform_13, window_bounds = array<i64: 4, 256>}]} {
    %c0 = arith.constant 0 : index
    %c0_0 = arith.constant 0 : index
    %0 = vector.load %arg1[%c0, %c0_0] : memref<16x256xf32, #tpu.memory_space<vmem>>, vector<16x256xf32>
    %c17_i32 = arith.constant 17 : i32
    %1 = tpu.dynamic_rotate %0 by %c17_i32 dim 1 : vector<16x256xf32>, i32 -> vector<16x256xf32>
    %c0_1 = arith.constant 0 : index
    %c0_2 = arith.constant 0 : index
    %c0_3 = arith.constant 0 : index
    %2 = vector.load %arg12[%c0_1, %c0_2, %c0_3] : memref<9x1x256xf32, #tpu.memory_space<vmem>>, vector<1x1x256xf32>
    %3 = vector.shape_cast %2 : vector<1x1x256xf32> to vector<1x256xf32>
    %4 = vector.broadcast %3 : vector<1x256xf32> to vector<16x256xf32>
    %5 = arith.mulf %1, %4 : vector<16x256xf32>
    %6 = arith.truncf %5 : vector<16x256xf32> to vector<16x256xbf16>
    %c0_4 = arith.constant 0 : index
    %c0_5 = arith.constant 0 : index
    %7 = vector.load %arg15[%c0_4, %c0_5] : memref<144x256xbf16, #tpu.memory_space<vmem>>, vector<16x256xbf16>
    tpu.vector_store %arg15[%c0_4, %c0_5], %6 {strides = array<i32>} : memref<144x256xbf16, #tpu.memory_space<vmem>>, vector<16x256xbf16>,
    %c16_i32 = arith.constant 16 : i32
    %8 = tpu.dynamic_rotate %0 by %c16_i32 dim 1 : vector<16x256xf32>, i32 -> vector<16x256xf32>
    %c1 = arith.constant 1 : index
    %c0_6 = arith.constant 0 : index
    %c0_7 = arith.constant 0 : index
    %9 = vector.load %arg12[%c1, %c0_6, %c0_7] : memref<9x1x256xf32, #tpu.memory_space<vmem>>, vector<1x1x256xf32>
    %10 = vector.shape_cast %9 : vector<1x1x256xf32> to vector<1x256xf32>
    %11 = vector.broadcast %10 : vector<1x256xf32> to vector<16x256xf32>
    %12 = arith.mulf %8, %11 : vector<16x256xf32>
    %13 = arith.truncf %12 : vector<16x256xf32> to vector<16x256xbf16>
    %c16 = arith.constant 16 : index
    %c0_8 = arith.constant 0 : index
    %14 = vector.load %arg15[%c16, %c0_8] : memref<144x256xbf16, #tpu.memory_space<vmem>>, vector<16x256xbf16>
    tpu.vector_store %arg15[%c16, %c0_8], %13 {strides = array<i32>} : memref<144x256xbf16, #tpu.memory_space<vmem>>, vector<16x256xbf16>,
    %c15_i32 = arith.constant 15 : i32
    %15 = tpu.dynamic_rotate %0 by %c15_i32 dim 1 : vector<16x256xf32>, i32 -> vector<16x256xf32>
    %c2 = arith.constant 2 : index
    %c0_9 = arith.constant 0 : index
    %c0_10 = arith.constant 0 : index
    %16 = vector.load %arg12[%c2, %c0_9, %c0_10] : memref<9x1x256xf32, #tpu.memory_space<vmem>>, vector<1x1x256xf32>
    %17 = vector.shape_cast %16 : vector<1x1x256xf32> to vector<1x256xf32>
    %18 = vector.broadcast %17 : vector<1x256xf32> to vector<16x256xf32>
    %19 = arith.mulf %15, %18 : vector<16x256xf32>
    %20 = arith.truncf %19 : vector<16x256xf32> to vector<16x256xbf16>
    %c32 = arith.constant 32 : index
    %c0_11 = arith.constant 0 : index
    %21 = vector.load %arg15[%c32, %c0_11] : memref<144x256xbf16, #tpu.memory_space<vmem>>, vector<16x256xbf16>
    tpu.vector_store %arg15[%c32, %c0_11], %20 {strides = array<i32>} : memref<144x256xbf16, #tpu.memory_space<vmem>>, vector<16x256xbf16>,
    %c1_i32 = arith.constant 1 : i32
    %22 = tpu.dynamic_rotate %0 by %c1_i32 dim 1 : vector<16x256xf32>, i32 -> vector<16x256xf32>
    %c3 = arith.constant 3 : index
    %c0_12 = arith.constant 0 : index
    %c0_13 = arith.constant 0 : index
    %23 = vector.load %arg12[%c3, %c0_12, %c0_13] : memref<9x1x256xf32, #tpu.memory_space<vmem>>, vector<1x1x256xf32>
    %24 = vector.shape_cast %23 : vector<1x1x256xf32> to vector<1x256xf32>
    %25 = vector.broadcast %24 : vector<1x256xf32> to vector<16x256xf32>
    %26 = arith.mulf %22, %25 : vector<16x256xf32>
    %27 = arith.truncf %26 : vector<16x256xf32> to vector<16x256xbf16>
    %c48 = arith.constant 48 : index
    %c0_14 = arith.constant 0 : index
    %28 = vector.load %arg15[%c48, %c0_14] : memref<144x256xbf16, #tpu.memory_space<vmem>>, vector<16x256xbf16>
    tpu.vector_store %arg15[%c48, %c0_14], %27 {strides = array<i32>} : memref<144x256xbf16, #tpu.memory_space<vmem>>, vector<16x256xbf16>,
    %c4 = arith.constant 4 : index
    %c0_15 = arith.constant 0 : index
    %c0_16 = arith.constant 0 : index
    %29 = vector.load %arg12[%c4, %c0_15, %c0_16] : memref<9x1x256xf32, #tpu.memory_space<vmem>>, vector<1x1x256xf32>
    %30 = vector.shape_cast %29 : vector<1x1x256xf32> to vector<1x256xf32>
    %31 = vector.broadcast %30 : vector<1x256xf32> to vector<16x256xf32>
    %32 = arith.mulf %0, %31 : vector<16x256xf32>
    %33 = arith.truncf %32 : vector<16x256xf32> to vector<16x256xbf16>
    %c64 = arith.constant 64 : index
    %c0_17 = arith.constant 0 : index
    %34 = vector.load %arg15[%c64, %c0_17] : memref<144x256xbf16, #tpu.memory_space<vmem>>, vector<16x256xbf16>
    tpu.vector_store %arg15[%c64, %c0_17], %33 {strides = array<i32>} : memref<144x256xbf16, #tpu.memory_space<vmem>>, vector<16x256xbf16>,
    %c255_i32 = arith.constant 255 : i32
    %35 = tpu.dynamic_rotate %0 by %c255_i32 dim 1 : vector<16x256xf32>, i32 -> vector<16x256xf32>
    %c5 = arith.constant 5 : index
    %c0_18 = arith.constant 0 : index
    %c0_19 = arith.constant 0 : index
    %36 = vector.load %arg12[%c5, %c0_18, %c0_19] : memref<9x1x256xf32, #tpu.memory_space<vmem>>, vector<1x1x256xf32>
    %37 = vector.shape_cast %36 : vector<1x1x256xf32> to vector<1x256xf32>
    %38 = vector.broadcast %37 : vector<1x256xf32> to vector<16x256xf32>
    %39 = arith.mulf %35, %38 : vector<16x256xf32>
    %40 = arith.truncf %39 : vector<16x256xf32> to vector<16x256xbf16>
    %c80 = arith.constant 80 : index
    %c0_20 = arith.constant 0 : index
    %41 = vector.load %arg15[%c80, %c0_20] : memref<144x256xbf16, #tpu.memory_space<vmem>>, vector<16x256xbf16>
    tpu.vector_store %arg15[%c80, %c0_20], %40 {strides = array<i32>} : memref<144x256xbf16, #tpu.memory_space<vmem>>, vector<16x256xbf16>,
    %c241_i32 = arith.constant 241 : i32
    %42 = tpu.dynamic_rotate %0 by %c241_i32 dim 1 : vector<16x256xf32>, i32 -> vector<16x256xf32>
    %c6 = arith.constant 6 : index
    %c0_21 = arith.constant 0 : index
    %c0_22 = arith.constant 0 : index
    %43 = vector.load %arg12[%c6, %c0_21, %c0_22] : memref<9x1x256xf32, #tpu.memory_space<vmem>>, vector<1x1x256xf32>
    %44 = vector.shape_cast %43 : vector<1x1x256xf32> to vector<1x256xf32>
    %45 = vector.broadcast %44 : vector<1x256xf32> to vector<16x256xf32>
    %46 = arith.mulf %42, %45 : vector<16x256xf32>
    %47 = arith.truncf %46 : vector<16x256xf32> to vector<16x256xbf16>
    %c96 = arith.constant 96 : index
    %c0_23 = arith.constant 0 : index
    %48 = vector.load %arg15[%c96, %c0_23] : memref<144x256xbf16, #tpu.memory_space<vmem>>, vector<16x256xbf16>
    tpu.vector_store %arg15[%c96, %c0_23], %47 {strides = array<i32>} : memref<144x256xbf16, #tpu.memory_space<vmem>>, vector<16x256xbf16>,
    %c240_i32 = arith.constant 240 : i32
    %49 = tpu.dynamic_rotate %0 by %c240_i32 dim 1 : vector<16x256xf32>, i32 -> vector<16x256xf32>
    %c7 = arith.constant 7 : index
    %c0_24 = arith.constant 0 : index
    %c0_25 = arith.constant 0 : index
    %50 = vector.load %arg12[%c7, %c0_24, %c0_25] : memref<9x1x256xf32, #tpu.memory_space<vmem>>, vector<1x1x256xf32>
    %51 = vector.shape_cast %50 : vector<1x1x256xf32> to vector<1x256xf32>
    %52 = vector.broadcast %51 : vector<1x256xf32> to vector<16x256xf32>
    %53 = arith.mulf %49, %52 : vector<16x256xf32>
    %54 = arith.truncf %53 : vector<16x256xf32> to vector<16x256xbf16>
    %c112 = arith.constant 112 : index
    %c0_26 = arith.constant 0 : index
    %55 = vector.load %arg15[%c112, %c0_26] : memref<144x256xbf16, #tpu.memory_space<vmem>>, vector<16x256xbf16>
    tpu.vector_store %arg15[%c112, %c0_26], %54 {strides = array<i32>} : memref<144x256xbf16, #tpu.memory_space<vmem>>, vector<16x256xbf16>,
    %c239_i32 = arith.constant 239 : i32
    %56 = tpu.dynamic_rotate %0 by %c239_i32 dim 1 : vector<16x256xf32>, i32 -> vector<16x256xf32>
    %c8 = arith.constant 8 : index
    %c0_27 = arith.constant 0 : index
    %c0_28 = arith.constant 0 : index
    %57 = vector.load %arg12[%c8, %c0_27, %c0_28] : memref<9x1x256xf32, #tpu.memory_space<vmem>>, vector<1x1x256xf32>
    %58 = vector.shape_cast %57 : vector<1x1x256xf32> to vector<1x256xf32>
    %59 = vector.broadcast %58 : vector<1x256xf32> to vector<16x256xf32>
    %60 = arith.mulf %56, %59 : vector<16x256xf32>
    %61 = arith.truncf %60 : vector<16x256xf32> to vector<16x256xbf16>
    %c128 = arith.constant 128 : index
    %c0_29 = arith.constant 0 : index
    %62 = vector.load %arg15[%c128, %c0_29] : memref<144x256xbf16, #tpu.memory_space<vmem>>, vector<16x256xbf16>
    tpu.vector_store %arg15[%c128, %c0_29], %61 {strides = array<i32>} : memref<144x256xbf16, #tpu.memory_space<vmem>>, vector<16x256xbf16>,
    %c0_30 = arith.constant 0 : index
    %c0_31 = arith.constant 0 : index
    %63 = vector.load %arg15[%c0_30, %c0_31] : memref<144x256xbf16, #tpu.memory_space<vmem>>, vector<144x256xbf16>
    %c0_32 = arith.constant 0 : index
    %c0_33 = arith.constant 0 : index
    %64 = vector.load %arg2[%c0_32, %c0_33] : memref<16x144xbf16, #tpu.memory_space<vmem>>, vector<16x144xbf16>
    %cst = arith.constant dense<0.000000e+00> : vector<16x256xf32>
    %65 = tpu.matmul %64, %63, %cst {dimension_numbers = #tpu.dot_dimension_numbers<[1], [0], [0], [1], [0, 0, 1, 1], [], []>} : vector<16x144xbf16>, vector<144x256xbf16>, vector<16x256xf32> -> vector<16x256xf32>
    %c0_34 = arith.constant 0 : index
    %c0_35 = arith.constant 0 : index
    %66 = vector.load %arg3[%c0_34, %c0_35] : memref<16x1xf32, #tpu.memory_space<vmem>>, vector<16x1xf32>
    %67 = vector.broadcast %66 : vector<16x1xf32> to vector<16x256xf32>
    %68 = arith.addf %65, %67 : vector<16x256xf32>
    %cst_36 = arith.constant 0.000000e+00 : f32
    %69 = vector.broadcast %cst_36 : f32 to vector<16x256xf32>
    %70 = arith.maximumf %68, %69 : vector<16x256xf32>
    %c17_i32_37 = arith.constant 17 : i32
    %71 = tpu.dynamic_rotate %70 by %c17_i32_37 dim 1 : vector<16x256xf32>, i32 -> vector<16x256xf32>
    %c0_38 = arith.constant 0 : index
    %c0_39 = arith.constant 0 : index
    %c0_40 = arith.constant 0 : index
    %72 = vector.load %arg12[%c0_38, %c0_39, %c0_40] : memref<9x1x256xf32, #tpu.memory_space<vmem>>, vector<1x1x256xf32>
    %73 = vector.shape_cast %72 : vector<1x1x256xf32> to vector<1x256xf32>
    %74 = vector.broadcast %73 : vector<1x256xf32> to vector<16x256xf32>
    %75 = arith.mulf %71, %74 : vector<16x256xf32>
    %76 = arith.truncf %75 : vector<16x256xf32> to vector<16x256xbf16>
    %c0_41 = arith.constant 0 : index
    %c0_42 = arith.constant 0 : index
    %77 = vector.load %arg15[%c0_41, %c0_42] : memref<144x256xbf16, #tpu.memory_space<vmem>>, vector<16x256xbf16>
    tpu.vector_store %arg15[%c0_41, %c0_42], %76 {strides = array<i32>} : memref<144x256xbf16, #tpu.memory_space<vmem>>, vector<16x256xbf16>,
    %c16_i32_43 = arith.constant 16 : i32
    %78 = tpu.dynamic_rotate %70 by %c16_i32_43 dim 1 : vector<16x256xf32>, i32 -> vector<16x256xf32>
    %c1_44 = arith.constant 1 : index
    %c0_45 = arith.constant 0 : index
    %c0_46 = arith.constant 0 : index
    %79 = vector.load %arg12[%c1_44, %c0_45, %c0_46] : memref<9x1x256xf32, #tpu.memory_space<vmem>>, vector<1x1x256xf32>
    %80 = vector.shape_cast %79 : vector<1x1x256xf32> to vector<1x256xf32>
    %81 = vector.broadcast %80 : vector<1x256xf32> to vector<16x256xf32>
    %82 = arith.mulf %78, %81 : vector<16x256xf32>
    %83 = arith.truncf %82 : vector<16x256xf32> to vector<16x256xbf16>
    %c16_47 = arith.constant 16 : index
    %c0_48 = arith.constant 0 : index
    %84 = vector.load %arg15[%c16_47, %c0_48] : memref<144x256xbf16, #tpu.memory_space<vmem>>, vector<16x256xbf16>
    tpu.vector_store %arg15[%c16_47, %c0_48], %83 {strides = array<i32>} : memref<144x256xbf16, #tpu.memory_space<vmem>>, vector<16x256xbf16>,
    %c15_i32_49 = arith.constant 15 : i32
    %85 = tpu.dynamic_rotate %70 by %c15_i32_49 dim 1 : vector<16x256xf32>, i32 -> vector<16x256xf32>
    %c2_50 = arith.constant 2 : index
    %c0_51 = arith.constant 0 : index
    %c0_52 = arith.constant 0 : index
    %86 = vector.load %arg12[%c2_50, %c0_51, %c0_52] : memref<9x1x256xf32, #tpu.memory_space<vmem>>, vector<1x1x256xf32>
    %87 = vector.shape_cast %86 : vector<1x1x256xf32> to vector<1x256xf32>
    %88 = vector.broadcast %87 : vector<1x256xf32> to vector<16x256xf32>
    %89 = arith.mulf %85, %88 : vector<16x256xf32>
    %90 = arith.truncf %89 : vector<16x256xf32> to vector<16x256xbf16>
    %c32_53 = arith.constant 32 : index
    %c0_54 = arith.constant 0 : index
    %91 = vector.load %arg15[%c32_53, %c0_54] : memref<144x256xbf16, #tpu.memory_space<vmem>>, vector<16x256xbf16>
    tpu.vector_store %arg15[%c32_53, %c0_54], %90 {strides = array<i32>} : memref<144x256xbf16, #tpu.memory_space<vmem>>, vector<16x256xbf16>,
    %c1_i32_55 = arith.constant 1 : i32
    %92 = tpu.dynamic_rotate %70 by %c1_i32_55 dim 1 : vector<16x256xf32>, i32 -> vector<16x256xf32>
    %c3_56 = arith.constant 3 : index
    %c0_57 = arith.constant 0 : index
    %c0_58 = arith.constant 0 : index
    %93 = vector.load %arg12[%c3_56, %c0_57, %c0_58] : memref<9x1x256xf32, #tpu.memory_space<vmem>>, vector<1x1x256xf32>
    %94 = vector.shape_cast %93 : vector<1x1x256xf32> to vector<1x256xf32>
    %95 = vector.broadcast %94 : vector<1x256xf32> to vector<16x256xf32>
    %96 = arith.mulf %92, %95 : vector<16x256xf32>
    %97 = arith.truncf %96 : vector<16x256xf32> to vector<16x256xbf16>
    %c48_59 = arith.constant 48 : index
    %c0_60 = arith.constant 0 : index
    %98 = vector.load %arg15[%c48_59, %c0_60] : memref<144x256xbf16, #tpu.memory_space<vmem>>, vector<16x256xbf16>
    tpu.vector_store %arg15[%c48_59, %c0_60], %97 {strides = array<i32>} : memref<144x256xbf16, #tpu.memory_space<vmem>>, vector<16x256xbf16>,
    %c4_61 = arith.constant 4 : index
    %c0_62 = arith.constant 0 : index
    %c0_63 = arith.constant 0 : index
    %99 = vector.load %arg12[%c4_61, %c0_62, %c0_63] : memref<9x1x256xf32, #tpu.memory_space<vmem>>, vector<1x1x256xf32>
    %100 = vector.shape_cast %99 : vector<1x1x256xf32> to vector<1x256xf32>
    %101 = vector.broadcast %100 : vector<1x256xf32> to vector<16x256xf32>
    %102 = arith.mulf %70, %101 : vector<16x256xf32>
    %103 = arith.truncf %102 : vector<16x256xf32> to vector<16x256xbf16>
    %c64_64 = arith.constant 64 : index
    %c0_65 = arith.constant 0 : index
    %104 = vector.load %arg15[%c64_64, %c0_65] : memref<144x256xbf16, #tpu.memory_space<vmem>>, vector<16x256xbf16>
    tpu.vector_store %arg15[%c64_64, %c0_65], %103 {strides = array<i32>} : memref<144x256xbf16, #tpu.memory_space<vmem>>, vector<16x256xbf16>,
    %c255_i32_66 = arith.constant 255 : i32
    %105 = tpu.dynamic_rotate %70 by %c255_i32_66 dim 1 : vector<16x256xf32>, i32 -> vector<16x256xf32>
    %c5_67 = arith.constant 5 : index
    %c0_68 = arith.constant 0 : index
    %c0_69 = arith.constant 0 : index
    %106 = vector.load %arg12[%c5_67, %c0_68, %c0_69] : memref<9x1x256xf32, #tpu.memory_space<vmem>>, vector<1x1x256xf32>
    %107 = vector.shape_cast %106 : vector<1x1x256xf32> to vector<1x256xf32>
    %108 = vector.broadcast %107 : vector<1x256xf32> to vector<16x256xf32>
    %109 = arith.mulf %105, %108 : vector<16x256xf32>
    %110 = arith.truncf %109 : vector<16x256xf32> to vector<16x256xbf16>
    %c80_70 = arith.constant 80 : index
    %c0_71 = arith.constant 0 : index
    %111 = vector.load %arg15[%c80_70, %c0_71] : memref<144x256xbf16, #tpu.memory_space<vmem>>, vector<16x256xbf16>
    tpu.vector_store %arg15[%c80_70, %c0_71], %110 {strides = array<i32>} : memref<144x256xbf16, #tpu.memory_space<vmem>>, vector<16x256xbf16>,
    %c241_i32_72 = arith.constant 241 : i32
    %112 = tpu.dynamic_rotate %70 by %c241_i32_72 dim 1 : vector<16x256xf32>, i32 -> vector<16x256xf32>
    %c6_73 = arith.constant 6 : index
    %c0_74 = arith.constant 0 : index
    %c0_75 = arith.constant 0 : index
    %113 = vector.load %arg12[%c6_73, %c0_74, %c0_75] : memref<9x1x256xf32, #tpu.memory_space<vmem>>, vector<1x1x256xf32>
    %114 = vector.shape_cast %113 : vector<1x1x256xf32> to vector<1x256xf32>
    %115 = vector.broadcast %114 : vector<1x256xf32> to vector<16x256xf32>
    %116 = arith.mulf %112, %115 : vector<16x256xf32>
    %117 = arith.truncf %116 : vector<16x256xf32> to vector<16x256xbf16>
    %c96_76 = arith.constant 96 : index
    %c0_77 = arith.constant 0 : index
    %118 = vector.load %arg15[%c96_76, %c0_77] : memref<144x256xbf16, #tpu.memory_space<vmem>>, vector<16x256xbf16>
    tpu.vector_store %arg15[%c96_76, %c0_77], %117 {strides = array<i32>} : memref<144x256xbf16, #tpu.memory_space<vmem>>, vector<16x256xbf16>,
    %c240_i32_78 = arith.constant 240 : i32
    %119 = tpu.dynamic_rotate %70 by %c240_i32_78 dim 1 : vector<16x256xf32>, i32 -> vector<16x256xf32>
    %c7_79 = arith.constant 7 : index
    %c0_80 = arith.constant 0 : index
    %c0_81 = arith.constant 0 : index
    %120 = vector.load %arg12[%c7_79, %c0_80, %c0_81] : memref<9x1x256xf32, #tpu.memory_space<vmem>>, vector<1x1x256xf32>
    %121 = vector.shape_cast %120 : vector<1x1x256xf32> to vector<1x256xf32>
    %122 = vector.broadcast %121 : vector<1x256xf32> to vector<16x256xf32>
    %123 = arith.mulf %119, %122 : vector<16x256xf32>
    %124 = arith.truncf %123 : vector<16x256xf32> to vector<16x256xbf16>
    %c112_82 = arith.constant 112 : index
    %c0_83 = arith.constant 0 : index
    %125 = vector.load %arg15[%c112_82, %c0_83] : memref<144x256xbf16, #tpu.memory_space<vmem>>, vector<16x256xbf16>
    tpu.vector_store %arg15[%c112_82, %c0_83], %124 {strides = array<i32>} : memref<144x256xbf16, #tpu.memory_space<vmem>>, vector<16x256xbf16>,
    %c239_i32_84 = arith.constant 239 : i32
    %126 = tpu.dynamic_rotate %70 by %c239_i32_84 dim 1 : vector<16x256xf32>, i32 -> vector<16x256xf32>
    %c8_85 = arith.constant 8 : index
    %c0_86 = arith.constant 0 : index
    %c0_87 = arith.constant 0 : index
    %127 = vector.load %arg12[%c8_85, %c0_86, %c0_87] : memref<9x1x256xf32, #tpu.memory_space<vmem>>, vector<1x1x256xf32>
    %128 = vector.shape_cast %127 : vector<1x1x256xf32> to vector<1x256xf32>
    %129 = vector.broadcast %128 : vector<1x256xf32> to vector<16x256xf32>
    %130 = arith.mulf %126, %129 : vector<16x256xf32>
    %131 = arith.truncf %130 : vector<16x256xf32> to vector<16x256xbf16>
    %c128_88 = arith.constant 128 : index
    %c0_89 = arith.constant 0 : index
    %132 = vector.load %arg15[%c128_88, %c0_89] : memref<144x256xbf16, #tpu.memory_space<vmem>>, vector<16x256xbf16>
    tpu.vector_store %arg15[%c128_88, %c0_89], %131 {strides = array<i32>} : memref<144x256xbf16, #tpu.memory_space<vmem>>, vector<16x256xbf16>,
    %c0_90 = arith.constant 0 : index
    %c0_91 = arith.constant 0 : index
    %133 = vector.load %arg15[%c0_90, %c0_91] : memref<144x256xbf16, #tpu.memory_space<vmem>>, vector<144x256xbf16>
    %c0_92 = arith.constant 0 : index
    %c0_93 = arith.constant 0 : index
    %134 = vector.load %arg4[%c0_92, %c0_93] : memref<16x144xbf16, #tpu.memory_space<vmem>>, vector<16x144xbf16>
    %cst_94 = arith.constant dense<0.000000e+00> : vector<16x256xf32>
    %135 = tpu.matmul %134, %133, %cst_94 {dimension_numbers = #tpu.dot_dimension_numbers<[1], [0], [0], [1], [0, 0, 1, 1], [], []>} : vector<16x144xbf16>, vector<144x256xbf16>, vector<16x256xf32> -> vector<16x256xf32>
    %c0_95 = arith.constant 0 : index
    %c0_96 = arith.constant 0 : index
    %136 = vector.load %arg5[%c0_95, %c0_96] : memref<16x1xf32, #tpu.memory_space<vmem>>, vector<16x1xf32>
    %137 = vector.broadcast %136 : vector<16x1xf32> to vector<16x256xf32>
    %138 = arith.addf %135, %137 : vector<16x256xf32>
    %139 = arith.truncf %138 : vector<16x256xf32> to vector<16x256xbf16>
    %c0_97 = arith.constant 0 : index
    %c0_98 = arith.constant 0 : index
    %140 = vector.load %arg10[%c0_97, %c0_98] : memref<256x128xbf16, #tpu.memory_space<vmem>>, vector<256x128xbf16>
    %cst_99 = arith.constant dense<0.000000e+00> : vector<16x128xf32>
    %141 = tpu.matmul %139, %140, %cst_99 {dimension_numbers = #tpu.dot_dimension_numbers<[1], [0], [0], [1], [0, 0, 1, 1], [], []>} : vector<16x256xbf16>, vector<256x128xbf16>, vector<16x128xf32> -> vector<16x128xf32>
    %c9_i32 = arith.constant 9 : i32
    %142 = tpu.dynamic_rotate %141 by %c9_i32 dim 1 : vector<16x128xf32>, i32 -> vector<16x128xf32>
    %c0_100 = arith.constant 0 : index
    %c0_101 = arith.constant 0 : index
    %c0_102 = arith.constant 0 : index
    %143 = vector.load %arg13[%c0_100, %c0_101, %c0_102] : memref<9x1x128xf32, #tpu.memory_space<vmem>>, vector<1x1x128xf32>
    %144 = vector.shape_cast %143 : vector<1x1x128xf32> to vector<1x128xf32>
    %145 = vector.broadcast %144 : vector<1x128xf32> to vector<16x128xf32>
    %146 = arith.mulf %142, %145 : vector<16x128xf32>
    %147 = arith.truncf %146 : vector<16x128xf32> to vector<16x128xbf16>
    %c0_103 = arith.constant 0 : index
    %c0_104 = arith.constant 0 : index
    %148 = vector.load %arg15[%c0_103, %c0_104] : memref<144x256xbf16, #tpu.memory_space<vmem>>, vector<16x128xbf16>
    tpu.vector_store %arg15[%c0_103, %c0_104], %147 {strides = array<i32>} : memref<144x256xbf16, #tpu.memory_space<vmem>>, vector<16x128xbf16>,
    %c8_i32 = arith.constant 8 : i32
    %149 = tpu.dynamic_rotate %141 by %c8_i32 dim 1 : vector<16x128xf32>, i32 -> vector<16x128xf32>
    %c1_105 = arith.constant 1 : index
    %c0_106 = arith.constant 0 : index
    %c0_107 = arith.constant 0 : index
    %150 = vector.load %arg13[%c1_105, %c0_106, %c0_107] : memref<9x1x128xf32, #tpu.memory_space<vmem>>, vector<1x1x128xf32>
    %151 = vector.shape_cast %150 : vector<1x1x128xf32> to vector<1x128xf32>
    %152 = vector.broadcast %151 : vector<1x128xf32> to vector<16x128xf32>
    %153 = arith.mulf %149, %152 : vector<16x128xf32>
    %154 = arith.truncf %153 : vector<16x128xf32> to vector<16x128xbf16>
    %c16_108 = arith.constant 16 : index
    %c0_109 = arith.constant 0 : index
    %155 = vector.load %arg15[%c16_108, %c0_109] : memref<144x256xbf16, #tpu.memory_space<vmem>>, vector<16x128xbf16>
    tpu.vector_store %arg15[%c16_108, %c0_109], %154 {strides = array<i32>} : memref<144x256xbf16, #tpu.memory_space<vmem>>, vector<16x128xbf16>,
    %c7_i32 = arith.constant 7 : i32
    %156 = tpu.dynamic_rotate %141 by %c7_i32 dim 1 : vector<16x128xf32>, i32 -> vector<16x128xf32>
    %c2_110 = arith.constant 2 : index
    %c0_111 = arith.constant 0 : index
    %c0_112 = arith.constant 0 : index
    %157 = vector.load %arg13[%c2_110, %c0_111, %c0_112] : memref<9x1x128xf32, #tpu.memory_space<vmem>>, vector<1x1x128xf32>
    %158 = vector.shape_cast %157 : vector<1x1x128xf32> to vector<1x128xf32>
    %159 = vector.broadcast %158 : vector<1x128xf32> to vector<16x128xf32>
    %160 = arith.mulf %156, %159 : vector<16x128xf32>
    %161 = arith.truncf %160 : vector<16x128xf32> to vector<16x128xbf16>
    %c32_113 = arith.constant 32 : index
    %c0_114 = arith.constant 0 : index
    %162 = vector.load %arg15[%c32_113, %c0_114] : memref<144x256xbf16, #tpu.memory_space<vmem>>, vector<16x128xbf16>
    tpu.vector_store %arg15[%c32_113, %c0_114], %161 {strides = array<i32>} : memref<144x256xbf16, #tpu.memory_space<vmem>>, vector<16x128xbf16>,
    %c1_i32_115 = arith.constant 1 : i32
    %163 = tpu.dynamic_rotate %141 by %c1_i32_115 dim 1 : vector<16x128xf32>, i32 -> vector<16x128xf32>
    %c3_116 = arith.constant 3 : index
    %c0_117 = arith.constant 0 : index
    %c0_118 = arith.constant 0 : index
    %164 = vector.load %arg13[%c3_116, %c0_117, %c0_118] : memref<9x1x128xf32, #tpu.memory_space<vmem>>, vector<1x1x128xf32>
    %165 = vector.shape_cast %164 : vector<1x1x128xf32> to vector<1x128xf32>
    %166 = vector.broadcast %165 : vector<1x128xf32> to vector<16x128xf32>
    %167 = arith.mulf %163, %166 : vector<16x128xf32>
    %168 = arith.truncf %167 : vector<16x128xf32> to vector<16x128xbf16>
    %c48_119 = arith.constant 48 : index
    %c0_120 = arith.constant 0 : index
    %169 = vector.load %arg15[%c48_119, %c0_120] : memref<144x256xbf16, #tpu.memory_space<vmem>>, vector<16x128xbf16>
    tpu.vector_store %arg15[%c48_119, %c0_120], %168 {strides = array<i32>} : memref<144x256xbf16, #tpu.memory_space<vmem>>, vector<16x128xbf16>,
    %c4_121 = arith.constant 4 : index
    %c0_122 = arith.constant 0 : index
    %c0_123 = arith.constant 0 : index
    %170 = vector.load %arg13[%c4_121, %c0_122, %c0_123] : memref<9x1x128xf32, #tpu.memory_space<vmem>>, vector<1x1x128xf32>
    %171 = vector.shape_cast %170 : vector<1x1x128xf32> to vector<1x128xf32>
    %172 = vector.broadcast %171 : vector<1x128xf32> to vector<16x128xf32>
    %173 = arith.mulf %141, %172 : vector<16x128xf32>
    %174 = arith.truncf %173 : vector<16x128xf32> to vector<16x128xbf16>
    %c64_124 = arith.constant 64 : index
    %c0_125 = arith.constant 0 : index
    %175 = vector.load %arg15[%c64_124, %c0_125] : memref<144x256xbf16, #tpu.memory_space<vmem>>, vector<16x128xbf16>
    tpu.vector_store %arg15[%c64_124, %c0_125], %174 {strides = array<i32>} : memref<144x256xbf16, #tpu.memory_space<vmem>>, vector<16x128xbf16>,
    %c127_i32 = arith.constant 127 : i32
    %176 = tpu.dynamic_rotate %141 by %c127_i32 dim 1 : vector<16x128xf32>, i32 -> vector<16x128xf32>
    %c5_126 = arith.constant 5 : index
    %c0_127 = arith.constant 0 : index
    %c0_128 = arith.constant 0 : index
    %177 = vector.load %arg13[%c5_126, %c0_127, %c0_128] : memref<9x1x128xf32, #tpu.memory_space<vmem>>, vector<1x1x128xf32>
    %178 = vector.shape_cast %177 : vector<1x1x128xf32> to vector<1x128xf32>
    %179 = vector.broadcast %178 : vector<1x128xf32> to vector<16x128xf32>
    %180 = arith.mulf %176, %179 : vector<16x128xf32>
    %181 = arith.truncf %180 : vector<16x128xf32> to vector<16x128xbf16>
    %c80_129 = arith.constant 80 : index
    %c0_130 = arith.constant 0 : index
    %182 = vector.load %arg15[%c80_129, %c0_130] : memref<144x256xbf16, #tpu.memory_space<vmem>>, vector<16x128xbf16>
    tpu.vector_store %arg15[%c80_129, %c0_130], %181 {strides = array<i32>} : memref<144x256xbf16, #tpu.memory_space<vmem>>, vector<16x128xbf16>,
    %c121_i32 = arith.constant 121 : i32
    %183 = tpu.dynamic_rotate %141 by %c121_i32 dim 1 : vector<16x128xf32>, i32 -> vector<16x128xf32>
    %c6_131 = arith.constant 6 : index
    %c0_132 = arith.constant 0 : index
    %c0_133 = arith.constant 0 : index
    %184 = vector.load %arg13[%c6_131, %c0_132, %c0_133] : memref<9x1x128xf32, #tpu.memory_space<vmem>>, vector<1x1x128xf32>
    %185 = vector.shape_cast %184 : vector<1x1x128xf32> to vector<1x128xf32>
    %186 = vector.broadcast %185 : vector<1x128xf32> to vector<16x128xf32>
    %187 = arith.mulf %183, %186 : vector<16x128xf32>
    %188 = arith.truncf %187 : vector<16x128xf32> to vector<16x128xbf16>
    %c96_134 = arith.constant 96 : index
    %c0_135 = arith.constant 0 : index
    %189 = vector.load %arg15[%c96_134, %c0_135] : memref<144x256xbf16, #tpu.memory_space<vmem>>, vector<16x128xbf16>
    tpu.vector_store %arg15[%c96_134, %c0_135], %188 {strides = array<i32>} : memref<144x256xbf16, #tpu.memory_space<vmem>>, vector<16x128xbf16>,
    %c120_i32 = arith.constant 120 : i32
    %190 = tpu.dynamic_rotate %141 by %c120_i32 dim 1 : vector<16x128xf32>, i32 -> vector<16x128xf32>
    %c7_136 = arith.constant 7 : index
    %c0_137 = arith.constant 0 : index
    %c0_138 = arith.constant 0 : index
    %191 = vector.load %arg13[%c7_136, %c0_137, %c0_138] : memref<9x1x128xf32, #tpu.memory_space<vmem>>, vector<1x1x128xf32>
    %192 = vector.shape_cast %191 : vector<1x1x128xf32> to vector<1x128xf32>
    %193 = vector.broadcast %192 : vector<1x128xf32> to vector<16x128xf32>
    %194 = arith.mulf %190, %193 : vector<16x128xf32>
    %195 = arith.truncf %194 : vector<16x128xf32> to vector<16x128xbf16>
    %c112_139 = arith.constant 112 : index
    %c0_140 = arith.constant 0 : index
    %196 = vector.load %arg15[%c112_139, %c0_140] : memref<144x256xbf16, #tpu.memory_space<vmem>>, vector<16x128xbf16>
    tpu.vector_store %arg15[%c112_139, %c0_140], %195 {strides = array<i32>} : memref<144x256xbf16, #tpu.memory_space<vmem>>, vector<16x128xbf16>,
    %c119_i32 = arith.constant 119 : i32
    %197 = tpu.dynamic_rotate %141 by %c119_i32 dim 1 : vector<16x128xf32>, i32 -> vector<16x128xf32>
    %c8_141 = arith.constant 8 : index
    %c0_142 = arith.constant 0 : index
    %c0_143 = arith.constant 0 : index
    %198 = vector.load %arg13[%c8_141, %c0_142, %c0_143] : memref<9x1x128xf32, #tpu.memory_space<vmem>>, vector<1x1x128xf32>
    %199 = vector.shape_cast %198 : vector<1x1x128xf32> to vector<1x128xf32>
    %200 = vector.broadcast %199 : vector<1x128xf32> to vector<16x128xf32>
    %201 = arith.mulf %197, %200 : vector<16x128xf32>
    %202 = arith.truncf %201 : vector<16x128xf32> to vector<16x128xbf16>
    %c128_144 = arith.constant 128 : index
    %c0_145 = arith.constant 0 : index
    %203 = vector.load %arg15[%c128_144, %c0_145] : memref<144x256xbf16, #tpu.memory_space<vmem>>, vector<16x128xbf16>
    tpu.vector_store %arg15[%c128_144, %c0_145], %202 {strides = array<i32>} : memref<144x256xbf16, #tpu.memory_space<vmem>>, vector<16x128xbf16>,
    %c0_146 = arith.constant 0 : index
    %c0_147 = arith.constant 0 : index
    %204 = vector.load %arg15[%c0_146, %c0_147] : memref<144x256xbf16, #tpu.memory_space<vmem>>, vector<144x128xbf16>
    %c0_148 = arith.constant 0 : index
    %c0_149 = arith.constant 0 : index
    %205 = vector.load %arg6[%c0_148, %c0_149] : memref<16x144xbf16, #tpu.memory_space<vmem>>, vector<16x144xbf16>
    %cst_150 = arith.constant dense<0.000000e+00> : vector<16x128xf32>
    %206 = tpu.matmul %205, %204, %cst_150 {dimension_numbers = #tpu.dot_dimension_numbers<[1], [0], [0], [1], [0, 0, 1, 1], [], []>} : vector<16x144xbf16>, vector<144x128xbf16>, vector<16x128xf32> -> vector<16x128xf32>
    %c0_151 = arith.constant 0 : index
    %c0_152 = arith.constant 0 : index
    %207 = vector.load %arg7[%c0_151, %c0_152] : memref<16x1xf32, #tpu.memory_space<vmem>>, vector<16x1xf32>
    %208 = vector.broadcast %207 : vector<16x1xf32> to vector<16x128xf32>
    %209 = arith.addf %206, %208 : vector<16x128xf32>
    %cst_153 = arith.constant 0.000000e+00 : f32
    %210 = vector.broadcast %cst_153 : f32 to vector<16x128xf32>
    %211 = arith.maximumf %209, %210 : vector<16x128xf32>
    %212 = arith.truncf %211 : vector<16x128xf32> to vector<16x128xbf16>
    %c0_154 = arith.constant 0 : index
    %c0_155 = arith.constant 0 : index
    %213 = vector.load %arg11[%c0_154, %c0_155] : memref<128x256xbf16, #tpu.memory_space<vmem>>, vector<128x256xbf16>
    %cst_156 = arith.constant dense<0.000000e+00> : vector<16x256xf32>
    %214 = tpu.matmul %212, %213, %cst_156 {dimension_numbers = #tpu.dot_dimension_numbers<[1], [0], [0], [1], [0, 0, 1, 1], [], []>} : vector<16x128xbf16>, vector<128x256xbf16>, vector<16x256xf32> -> vector<16x256xf32>
    %c17_i32_157 = arith.constant 17 : i32
    %215 = tpu.dynamic_rotate %214 by %c17_i32_157 dim 1 : vector<16x256xf32>, i32 -> vector<16x256xf32>
    %c0_158 = arith.constant 0 : index
    %c0_159 = arith.constant 0 : index
    %c0_160 = arith.constant 0 : index
    %216 = vector.load %arg12[%c0_158, %c0_159, %c0_160] : memref<9x1x256xf32, #tpu.memory_space<vmem>>, vector<1x1x256xf32>
    %217 = vector.shape_cast %216 : vector<1x1x256xf32> to vector<1x256xf32>
    %218 = vector.broadcast %217 : vector<1x256xf32> to vector<16x256xf32>
    %219 = arith.mulf %215, %218 : vector<16x256xf32>
    %220 = arith.truncf %219 : vector<16x256xf32> to vector<16x256xbf16>
    %c0_161 = arith.constant 0 : index
    %c0_162 = arith.constant 0 : index
    %221 = vector.load %arg15[%c0_161, %c0_162] : memref<144x256xbf16, #tpu.memory_space<vmem>>, vector<16x256xbf16>
    tpu.vector_store %arg15[%c0_161, %c0_162], %220 {strides = array<i32>} : memref<144x256xbf16, #tpu.memory_space<vmem>>, vector<16x256xbf16>,
    %c16_i32_163 = arith.constant 16 : i32
    %222 = tpu.dynamic_rotate %214 by %c16_i32_163 dim 1 : vector<16x256xf32>, i32 -> vector<16x256xf32>
    %c1_164 = arith.constant 1 : index
    %c0_165 = arith.constant 0 : index
    %c0_166 = arith.constant 0 : index
    %223 = vector.load %arg12[%c1_164, %c0_165, %c0_166] : memref<9x1x256xf32, #tpu.memory_space<vmem>>, vector<1x1x256xf32>
    %224 = vector.shape_cast %223 : vector<1x1x256xf32> to vector<1x256xf32>
    %225 = vector.broadcast %224 : vector<1x256xf32> to vector<16x256xf32>
    %226 = arith.mulf %222, %225 : vector<16x256xf32>
    %227 = arith.truncf %226 : vector<16x256xf32> to vector<16x256xbf16>
    %c16_167 = arith.constant 16 : index
    %c0_168 = arith.constant 0 : index
    %228 = vector.load %arg15[%c16_167, %c0_168] : memref<144x256xbf16, #tpu.memory_space<vmem>>, vector<16x256xbf16>
    tpu.vector_store %arg15[%c16_167, %c0_168], %227 {strides = array<i32>} : memref<144x256xbf16, #tpu.memory_space<vmem>>, vector<16x256xbf16>,
    %c15_i32_169 = arith.constant 15 : i32
    %229 = tpu.dynamic_rotate %214 by %c15_i32_169 dim 1 : vector<16x256xf32>, i32 -> vector<16x256xf32>
    %c2_170 = arith.constant 2 : index
    %c0_171 = arith.constant 0 : index
    %c0_172 = arith.constant 0 : index
    %230 = vector.load %arg12[%c2_170, %c0_171, %c0_172] : memref<9x1x256xf32, #tpu.memory_space<vmem>>, vector<1x1x256xf32>
    %231 = vector.shape_cast %230 : vector<1x1x256xf32> to vector<1x256xf32>
    %232 = vector.broadcast %231 : vector<1x256xf32> to vector<16x256xf32>
    %233 = arith.mulf %229, %232 : vector<16x256xf32>
    %234 = arith.truncf %233 : vector<16x256xf32> to vector<16x256xbf16>
    %c32_173 = arith.constant 32 : index
    %c0_174 = arith.constant 0 : index
    %235 = vector.load %arg15[%c32_173, %c0_174] : memref<144x256xbf16, #tpu.memory_space<vmem>>, vector<16x256xbf16>
    tpu.vector_store %arg15[%c32_173, %c0_174], %234 {strides = array<i32>} : memref<144x256xbf16, #tpu.memory_space<vmem>>, vector<16x256xbf16>,
    %c1_i32_175 = arith.constant 1 : i32
    %236 = tpu.dynamic_rotate %214 by %c1_i32_175 dim 1 : vector<16x256xf32>, i32 -> vector<16x256xf32>
    %c3_176 = arith.constant 3 : index
    %c0_177 = arith.constant 0 : index
    %c0_178 = arith.constant 0 : index
    %237 = vector.load %arg12[%c3_176, %c0_177, %c0_178] : memref<9x1x256xf32, #tpu.memory_space<vmem>>, vector<1x1x256xf32>
    %238 = vector.shape_cast %237 : vector<1x1x256xf32> to vector<1x256xf32>
    %239 = vector.broadcast %238 : vector<1x256xf32> to vector<16x256xf32>
    %240 = arith.mulf %236, %239 : vector<16x256xf32>
    %241 = arith.truncf %240 : vector<16x256xf32> to vector<16x256xbf16>
    %c48_179 = arith.constant 48 : index
    %c0_180 = arith.constant 0 : index
    %242 = vector.load %arg15[%c48_179, %c0_180] : memref<144x256xbf16, #tpu.memory_space<vmem>>, vector<16x256xbf16>
    tpu.vector_store %arg15[%c48_179, %c0_180], %241 {strides = array<i32>} : memref<144x256xbf16, #tpu.memory_space<vmem>>, vector<16x256xbf16>,
    %c4_181 = arith.constant 4 : index
    %c0_182 = arith.constant 0 : index
    %c0_183 = arith.constant 0 : index
    %243 = vector.load %arg12[%c4_181, %c0_182, %c0_183] : memref<9x1x256xf32, #tpu.memory_space<vmem>>, vector<1x1x256xf32>
    %244 = vector.shape_cast %243 : vector<1x1x256xf32> to vector<1x256xf32>
    %245 = vector.broadcast %244 : vector<1x256xf32> to vector<16x256xf32>
    %246 = arith.mulf %214, %245 : vector<16x256xf32>
    %247 = arith.truncf %246 : vector<16x256xf32> to vector<16x256xbf16>
    %c64_184 = arith.constant 64 : index
    %c0_185 = arith.constant 0 : index
    %248 = vector.load %arg15[%c64_184, %c0_185] : memref<144x256xbf16, #tpu.memory_space<vmem>>, vector<16x256xbf16>
    tpu.vector_store %arg15[%c64_184, %c0_185], %247 {strides = array<i32>} : memref<144x256xbf16, #tpu.memory_space<vmem>>, vector<16x256xbf16>,
    %c255_i32_186 = arith.constant 255 : i32
    %249 = tpu.dynamic_rotate %214 by %c255_i32_186 dim 1 : vector<16x256xf32>, i32 -> vector<16x256xf32>
    %c5_187 = arith.constant 5 : index
    %c0_188 = arith.constant 0 : index
    %c0_189 = arith.constant 0 : index
    %250 = vector.load %arg12[%c5_187, %c0_188, %c0_189] : memref<9x1x256xf32, #tpu.memory_space<vmem>>, vector<1x1x256xf32>
    %251 = vector.shape_cast %250 : vector<1x1x256xf32> to vector<1x256xf32>
    %252 = vector.broadcast %251 : vector<1x256xf32> to vector<16x256xf32>
    %253 = arith.mulf %249, %252 : vector<16x256xf32>
    %254 = arith.truncf %253 : vector<16x256xf32> to vector<16x256xbf16>
    %c80_190 = arith.constant 80 : index
    %c0_191 = arith.constant 0 : index
    %255 = vector.load %arg15[%c80_190, %c0_191] : memref<144x256xbf16, #tpu.memory_space<vmem>>, vector<16x256xbf16>
    tpu.vector_store %arg15[%c80_190, %c0_191], %254 {strides = array<i32>} : memref<144x256xbf16, #tpu.memory_space<vmem>>, vector<16x256xbf16>,
    %c241_i32_192 = arith.constant 241 : i32
    %256 = tpu.dynamic_rotate %214 by %c241_i32_192 dim 1 : vector<16x256xf32>, i32 -> vector<16x256xf32>
    %c6_193 = arith.constant 6 : index
    %c0_194 = arith.constant 0 : index
    %c0_195 = arith.constant 0 : index
    %257 = vector.load %arg12[%c6_193, %c0_194, %c0_195] : memref<9x1x256xf32, #tpu.memory_space<vmem>>, vector<1x1x256xf32>
    %258 = vector.shape_cast %257 : vector<1x1x256xf32> to vector<1x256xf32>
    %259 = vector.broadcast %258 : vector<1x256xf32> to vector<16x256xf32>
    %260 = arith.mulf %256, %259 : vector<16x256xf32>
    %261 = arith.truncf %260 : vector<16x256xf32> to vector<16x256xbf16>
    %c96_196 = arith.constant 96 : index
    %c0_197 = arith.constant 0 : index
    %262 = vector.load %arg15[%c96_196, %c0_197] : memref<144x256xbf16, #tpu.memory_space<vmem>>, vector<16x256xbf16>
    tpu.vector_store %arg15[%c96_196, %c0_197], %261 {strides = array<i32>} : memref<144x256xbf16, #tpu.memory_space<vmem>>, vector<16x256xbf16>,
    %c240_i32_198 = arith.constant 240 : i32
    %263 = tpu.dynamic_rotate %214 by %c240_i32_198 dim 1 : vector<16x256xf32>, i32 -> vector<16x256xf32>
    %c7_199 = arith.constant 7 : index
    %c0_200 = arith.constant 0 : index
    %c0_201 = arith.constant 0 : index
    %264 = vector.load %arg12[%c7_199, %c0_200, %c0_201] : memref<9x1x256xf32, #tpu.memory_space<vmem>>, vector<1x1x256xf32>
    %265 = vector.shape_cast %264 : vector<1x1x256xf32> to vector<1x256xf32>
    %266 = vector.broadcast %265 : vector<1x256xf32> to vector<16x256xf32>
    %267 = arith.mulf %263, %266 : vector<16x256xf32>
    %268 = arith.truncf %267 : vector<16x256xf32> to vector<16x256xbf16>
    %c112_202 = arith.constant 112 : index
    %c0_203 = arith.constant 0 : index
    %269 = vector.load %arg15[%c112_202, %c0_203] : memref<144x256xbf16, #tpu.memory_space<vmem>>, vector<16x256xbf16>
    tpu.vector_store %arg15[%c112_202, %c0_203], %268 {strides = array<i32>} : memref<144x256xbf16, #tpu.memory_space<vmem>>, vector<16x256xbf16>,
    %c239_i32_204 = arith.constant 239 : i32
    %270 = tpu.dynamic_rotate %214 by %c239_i32_204 dim 1 : vector<16x256xf32>, i32 -> vector<16x256xf32>
    %c8_205 = arith.constant 8 : index
    %c0_206 = arith.constant 0 : index
    %c0_207 = arith.constant 0 : index
    %271 = vector.load %arg12[%c8_205, %c0_206, %c0_207] : memref<9x1x256xf32, #tpu.memory_space<vmem>>, vector<1x1x256xf32>
    %272 = vector.shape_cast %271 : vector<1x1x256xf32> to vector<1x256xf32>
    %273 = vector.broadcast %272 : vector<1x256xf32> to vector<16x256xf32>
    %274 = arith.mulf %270, %273 : vector<16x256xf32>
    %275 = arith.truncf %274 : vector<16x256xf32> to vector<16x256xbf16>
    %c128_208 = arith.constant 128 : index
    %c0_209 = arith.constant 0 : index
    %276 = vector.load %arg15[%c128_208, %c0_209] : memref<144x256xbf16, #tpu.memory_space<vmem>>, vector<16x256xbf16>
    tpu.vector_store %arg15[%c128_208, %c0_209], %275 {strides = array<i32>} : memref<144x256xbf16, #tpu.memory_space<vmem>>, vector<16x256xbf16>,
    %c0_210 = arith.constant 0 : index
    %c0_211 = arith.constant 0 : index
    %277 = vector.load %arg15[%c0_210, %c0_211] : memref<144x256xbf16, #tpu.memory_space<vmem>>, vector<144x256xbf16>
    %c0_212 = arith.constant 0 : index
    %c0_213 = arith.constant 0 : index
    %278 = vector.load %arg8[%c0_212, %c0_213] : memref<4x144xbf16, #tpu.memory_space<vmem>>, vector<4x144xbf16>
    %cst_214 = arith.constant dense<0.000000e+00> : vector<4x256xf32>
    %279 = tpu.matmul %278, %277, %cst_214 {dimension_numbers = #tpu.dot_dimension_numbers<[1], [0], [0], [1], [0, 0, 1, 1], [], []>} : vector<4x144xbf16>, vector<144x256xbf16>, vector<4x256xf32> -> vector<4x256xf32>
    %c0_215 = arith.constant 0 : index
    %c0_216 = arith.constant 0 : index
    %280 = vector.load %arg9[%c0_215, %c0_216] : memref<4x1xf32, #tpu.memory_space<vmem>>, vector<4x1xf32>
    %281 = vector.broadcast %280 : vector<4x1xf32> to vector<4x256xf32>
    %282 = arith.addf %279, %281 : vector<4x256xf32>
    %c0_217 = arith.constant 0 : index
    %c0_218 = arith.constant 0 : index
    %283 = vector.load %arg14[%c0_217, %c0_218] : memref<4x256xf32, #tpu.memory_space<vmem>>, vector<4x256xf32>
    tpu.vector_store %arg14[%c0_217, %c0_218], %282 {strides = array<i32>} : memref<4x256xf32, #tpu.memory_space<vmem>>, vector<4x256xf32>,
    return
  }
  func.func @transform_0(%arg0: i32) -> (i32, i32) {
    %c0_i32 = arith.constant 0 : i32
    %c0_i32_0 = arith.constant 0 : i32
    return %c0_i32, %arg0 : i32, i32
  }
  func.func @transform_1(%arg0: i32) -> (i32, i32) {
    %c0_i32 = arith.constant 0 : i32
    %c0_i32_0 = arith.constant 0 : i32
    %c0_i32_1 = arith.constant 0 : i32
    return %c0_i32, %c0_i32_0 : i32, i32
  }
  func.func @transform_2(%arg0: i32) -> (i32, i32) {
    %c0_i32 = arith.constant 0 : i32
    %c0_i32_0 = arith.constant 0 : i32
    %c0_i32_1 = arith.constant 0 : i32
    return %c0_i32, %c0_i32_0 : i32, i32
  }
  func.func @transform_3(%arg0: i32) -> (i32, i32) {
    %c0_i32 = arith.constant 0 : i32
    %c0_i32_0 = arith.constant 0 : i32
    %c0_i32_1 = arith.constant 0 : i32
    return %c0_i32, %c0_i32_0 : i32, i32
  }
  func.func @transform_4(%arg0: i32) -> (i32, i32) {
    %c0_i32 = arith.constant 0 : i32
    %c0_i32_0 = arith.constant 0 : i32
    %c0_i32_1 = arith.constant 0 : i32
    return %c0_i32, %c0_i32_0 : i32, i32
  }
  func.func @transform_5(%arg0: i32) -> (i32, i32) {
    %c0_i32 = arith.constant 0 : i32
    %c0_i32_0 = arith.constant 0 : i32
    %c0_i32_1 = arith.constant 0 : i32
    return %c0_i32, %c0_i32_0 : i32, i32
  }
  func.func @transform_6(%arg0: i32) -> (i32, i32) {
    %c0_i32 = arith.constant 0 : i32
    %c0_i32_0 = arith.constant 0 : i32
    %c0_i32_1 = arith.constant 0 : i32
    return %c0_i32, %c0_i32_0 : i32, i32
  }
  func.func @transform_7(%arg0: i32) -> (i32, i32) {
    %c0_i32 = arith.constant 0 : i32
    %c0_i32_0 = arith.constant 0 : i32
    %c0_i32_1 = arith.constant 0 : i32
    return %c0_i32, %c0_i32_0 : i32, i32
  }
  func.func @transform_8(%arg0: i32) -> (i32, i32) {
    %c0_i32 = arith.constant 0 : i32
    %c0_i32_0 = arith.constant 0 : i32
    %c0_i32_1 = arith.constant 0 : i32
    return %c0_i32, %c0_i32_0 : i32, i32
  }
  func.func @transform_9(%arg0: i32) -> (i32, i32) {
    %c0_i32 = arith.constant 0 : i32
    %c0_i32_0 = arith.constant 0 : i32
    %c0_i32_1 = arith.constant 0 : i32
    return %c0_i32, %c0_i32_0 : i32, i32
  }
  func.func @transform_10(%arg0: i32) -> (i32, i32) {
    %c0_i32 = arith.constant 0 : i32
    %c0_i32_0 = arith.constant 0 : i32
    %c0_i32_1 = arith.constant 0 : i32
    return %c0_i32, %c0_i32_0 : i32, i32
  }
  func.func @transform_11(%arg0: i32) -> (i32, i32, i32) {
    %c0_i32 = arith.constant 0 : i32
    %c0_i32_0 = arith.constant 0 : i32
    %c0_i32_1 = arith.constant 0 : i32
    %c0_i32_2 = arith.constant 0 : i32
    return %c0_i32, %c0_i32_0, %c0_i32_1 : i32, i32, i32
  }
  func.func @transform_12(%arg0: i32) -> (i32, i32, i32) {
    %c0_i32 = arith.constant 0 : i32
    %c0_i32_0 = arith.constant 0 : i32
    %c0_i32_1 = arith.constant 0 : i32
    %c0_i32_2 = arith.constant 0 : i32
    return %c0_i32, %c0_i32_0, %c0_i32_1 : i32, i32, i32
  }
  func.func @transform_13(%arg0: i32) -> (i32, i32) {
    %c0_i32 = arith.constant 0 : i32
    %c0_i32_0 = arith.constant 0 : i32
    return %c0_i32, %arg0 : i32, i32
  }
}

</mosaic_0001>

<bundles_post_ra>
// kernel: autoencoder_forward.1
= control target key start
LH: loop header
LB: loop body
LE: loop exit
PB: predicated region body
PF: predicated region fallthrough
CT: control target
= control target key end

     0   :  { %s2492_s25 = smov 0   ;;  %s2494_s26 = smov 0   ;;  %s3298_s0 = inlined_call_operand.vmem [shape: f32[16,512], index: 0, kind: input, shape index: {}]   ;;  %s3299_s1 = inlined_call_operand.vmem [shape: bf16[16,144], index: 1, kind: input, shape index: {}]   ;;  %s3300_s2 = inlined_call_operand.vmem [shape: f32[16,1], index: 2, kind: input, shape index: {}]   ;;  %s3301_s3 = inlined_call_operand.vmem [shape: bf16[16,144], index: 3, kind: input, shape index: {}]   ;;  %s3302_s4 = inlined_call_operand.vmem [shape: f32[16,1], index: 4, kind: input, shape index: {}]   ;;  %s3303_s5 = inlined_call_operand.vmem [shape: bf16[16,144], index: 5, kind: input, shape index: {}]   ;;  %s3304_s6 = inlined_call_operand.vmem [shape: f32[16,1], index: 6, kind: input, shape index: {}]   ;;  %s3305_s7 = inlined_call_operand.vmem [shape: bf16[4,144], index: 7, kind: input, shape index: {}]   ;;  %s3306_s8 = inlined_call_operand.vmem [shape: f32[4,1], index: 8, kind: input, shape index: {}]   ;;  %s3307_s9 = inlined_call_operand.vmem [shape: bf16[256,128], index: 9, kind: input, shape index: {}]   ;;  %s3308_s10 = inlined_call_operand.vmem [shape: bf16[128,256], index: 10, kind: input, shape index: {}]   ;;  %s3309_s11 = inlined_call_operand.vmem [shape: f32[9,1,256], index: 11, kind: input, shape index: {}]   ;;  %s3310_s12 = inlined_call_operand.vmem [shape: f32[9,1,128], index: 12, kind: input, shape index: {}]   ;;  %s3311_s13 = inlined_call_operand.vmem [shape: f32[4,512], index: 13, kind: output, shape index: {}]  }
   0x1   :  { %s2496_s27 = smov 0  }
   0x2 LB: > { %s2509_s29 = sadd.s32 1, %s2405_s27   ;;  %s30_s14 = sadd.s32 1, %s2401_s26  ;;  %s2405_s27 = sphi %s2496_s27, %s3339_s27   ;;  %s2401_s26 = sphi %s2494_s26, %s3338_s26   ;;  %s2397_s25 = sphi %s2492_s25, %s3337_s25  }
   0x3   : > { %s27_s30 = ssub.s32 %s2405_s27, %s2509_s29  ;;  %p37_p1 = scmp.ne.s32.totalorder %s2401_s26, %s2397_s25 }
   0x4   : > { %p28_p0 = scmp.eq.s32.totalorder %s27_s30, 0  ;;  %p38_p2 = scmp.eq.s32.totalorder %s2405_s27, 0 }
   0x5   : > { %p2176_p4 = scmp.ge.s32.totalorder %s2405_s27, 2 }
   0x6   : > { %s2518_s15 = scalar_select %p28_p0, %s2401_s26, %s30_s14  }
   0x7   : > { %p39_p3 = por %p38_p2, %p37_p1  ;;  %377 = sbr.rel (%p2176_p4) target bundleno = 21 (0x15), region = 64 }
   0xe   : > { %380 = sbr.rel (!%p39_p3) target bundleno = 21 (0x15), region = 68  ;;  %s382_s16 = sand.u32 (%p39_p3), 1, %s2401_s26  }
   0xf   : > { %s2270_s17 = sshll.u32 (%p39_p3), %s2405_s27, 4  ;;  %s2177_s18 = sshll.u32 (%p39_p3), %s382_s16, 5 }
  0x10   : > { %s387_s21 = scalar_lea.vmem (%p39_p3), %s3298_s0, %s2270_s17  ;;  %s384_s22 = scalar_lea.vmem (%p39_p3), [#allocation3], %s2177_s18 }
  0x11   : > { %v400_v0 = vld [vmem:[%s387_s21] sm:$0xff] (%p39_p3)  ;;  %v402_v1 = vld [vmem:[%s387_s21 + $0x8] sm:$0xff] (%p39_p3) }
  0x12   : > { %v404_v2 = vld [vmem:[%s387_s21 + $0x20] sm:$0xff] (%p39_p3)  ;;  %401 = vst [vmem:[%s384_s22] sm:$0xff] (%p39_p3), %v400_v0  ;;  %403 = vst [vmem:[%s384_s22 + $0x8] sm:$0xff] (%p39_p3), %v402_v1  ;;  %v406_v3 = vld [vmem:[%s387_s21 + $0x28] sm:$0xff] (%p39_p3) }
  0x13   : > { %405 = vst [vmem:[%s384_s22 + $0x10] sm:$0xff] (%p39_p3), %v404_v2  ;;  %407 = vst [vmem:[%s384_s22 + $0x18] sm:$0xff] (%p39_p3), %v406_v3 }
  0x15 PF: > { %p2180_p5 = scmp.ge.s32.totalorder %s2405_s27, 1  ;;  %p412_p6 = scmp.lt.s32.totalorder %s2405_s27, 3 }
  0x17   : > { %p413_p7 = pnand %p2180_p5, %p412_p6 }
  0x18   : > { %s419_s23 = sand.u32 (!%p413_p7), 1, %s2397_s25   ;;  %s3320_s14 = smov (!%p413_p7), 17   ;;  %v482_v8 = vlaneseq (!%p413_p7)  ;;  %v2187_v12 = vld [vmem:[%s3309_s11 + $0x8] sm:$0x3] (!%p413_p7)  ;;  %v2336_v21 = vld [vmem:[%s3299_s1 + $0x4] ss:$8 sps:$4 sm:$0xff] (!%p413_p7)  }
  0x19   : > { %416 = sbr.rel (%p413_p7) target bundleno = 2041 (0x7f9), region = 91  ;;  %s2181_s24 = sshll.u32 (!%p413_p7), %s419_s23, 5  ;;  %vm809_vm0 = vcmask (!%p413_p7), 130048   ;;  %v2415_v22 = vmov (!%p413_p7), 0   ;;  %v788_v23 = vld [vmem:[%s3300_s2] sm:$0xff] (!%p413_p7)  ;;  %v789_v24 = vld [vmem:[%s3300_s2 + $0x8] sm:$0xff] (!%p413_p7) }
  0x1a   : > { %s421_s30 = scalar_lea.vmem (!%p413_p7), [#allocation3], %s2181_s24  ;;  %s3318_s16 = smov (!%p413_p7), 16   ;;  %v492_v9 = vshrl.u32 (!%p413_p7), %v482_v8, 7  ;;  %2194 = vmatprep.mubr.msk.bf16.mxu0 (!%p413_p7), %vm809_vm0, %v2336_v21  ;;  %2332 = vset.pattern.permute.xlu0 (!%p413_p7), %v2415_v22  ;;  %v2594_v25 = vand.u32 (!%p413_p7), 127, %v482_v8  ;;  %v489_v26 = vld [vmem:[%s3309_s11] sm:$0x3] (!%p413_p7) }
  0x1b   : > { %v471_v4 = vld [vmem:[%s421_s30 + $0x8] sm:$0xff] (!%p413_p7)  ;;  %v470_v5 = vld [vmem:[%s421_s30] sm:$0xff] (!%p413_p7)  ;;  %v473_v6 = vld [vmem:[%s421_s30 + $0x18] sm:$0xff] (!%p413_p7)  ;;  %s3316_s25 = smov (!%p413_p7), 15   ;;  %s3326_s19 = smov (!%p413_p7), 1   ;;  %2333 = vset.pattern.permute.xlu1 (!%p413_p7), %v2415_v22 }
  0x1c   : > { %478 = vrot.lane.b32.xlu1 (!%p413_p7), %v471_v4, %s3320_s14  ;;  %474 = vrot.lane.b32.xlu0 (!%p413_p7), %v470_v5, %s3320_s14  ;;  %v472_v7 = vld [vmem:[%s421_s30 + $0x10] sm:$0xff] (!%p413_p7)  ;;  %v2539_v10 = vsub.s32 (!%p413_p7), 1, %v492_v9  ;;  %v2541_v11 = vsub.s32 (!%p413_p7), 0, %v492_v9  ;;  %s3322_s20 = smov (!%p413_p7), 127   ;;  %s3314_s21 = smov (!%p413_p7), 113   ;;  %vm484_vm1 = vcmp.lt.s32.totalorder (!%p413_p7), %v2594_v25, 17 }
  0x1d   : > { %s3312_s22 = smov (!%p413_p7), 112   ;;  %s3324_s30 = smov (!%p413_p7), 111   ;;  %v2184_v41 = vld [vmem:[%s3309_s11 + $0x2] sm:$0x3] (!%p413_p7)  ;;  %vm517_vm2 = vcmp.lt.s32.totalorder (!%p413_p7), %v2594_v25, 16  ;;  %vm551_vm3 = vcmp.lt.s32.totalorder (!%p413_p7), %v2594_v25, 15 }
  0x1e   : > { %v621_v13 = vrot.slane (!%p413_p7), %v2187_v12, %v2539_v10  ;;  %v617_v14 = vrot.slane (!%p413_p7), %v2187_v12, %v2541_v11  ;;  %v498_v29 = vrot.slane (!%p413_p7), %v489_v26, %v2539_v10  ;;  %v494_v30 = vrot.slane (!%p413_p7), %v489_v26, %v2541_v11  ;;  %v2185_v58 = vld [vmem:[%s3309_s11 + $0x4] sm:$0x3] (!%p413_p7)  ;;  %s3328_s28 = smov (!%p413_p7), 112   ;;  %s3329_s17 = smov (!%p413_p7), 127  }
  0x1f   : > { %v528_v46 = vrot.slane (!%p413_p7), %v2184_v41, %v2541_v11  ;;  %v532_v47 = vrot.slane (!%p413_p7), %v2184_v41, %v2539_v10  ;;  %v562_v63 = vrot.slane (!%p413_p7), %v2185_v58, %v2541_v11  ;;  %v566_v0 = vrot.slane (!%p413_p7), %v2185_v58, %v2539_v10  ;;  %s2419_s18 = smov (!%p413_p7), 121   ;;  %s2420_s23 = smov (!%p413_p7), 120  }
  0x20   : > { %480 = vrot.lane.b32.xlu1 %v473_v6, %s3320_s14  ;;  %476 = vrot.lane.b32.xlu0 %v472_v7, %s3320_s14  ;;  %v2550_v15 = vmul.f32 %v621_v13, %v471_v4  ;;  %v2552_v16 = vmul.f32 %v621_v13, %v473_v6  ;;  %v2554_v17 = vmul.f32 %v617_v14, %v470_v5  ;;  %v2186_v13 = vld [vmem:[%s3309_s11 + $0x6] sm:$0x3]  ;;  %vm585_vm4 = vcmp.lt.s32.totalorder %v2594_v25, 1 }
  0x21   : > { %v2556_v18 = vmul.f32 %v617_v14, %v472_v7  ;;  %v596_v26 = vrot.slane %v2186_v13, %v2541_v11  ;;  %vm640_vm5 = vcmp.lt.s32.totalorder %v2594_v25, 127  ;;  %vm674_vm6 = vcmp.lt.s32.totalorder %v2594_v25, 113 }
  0x22   : > { %v629_v19 = vpack.c.bf16 %v2552_v16, %v2550_v15  ;;  %v2189_v15 = vld [vmem:[%s3309_s11 + $0xc] sm:$0x3]  ;;  %vm708_vm7 = vcmp.lt.s32.totalorder %v2594_v25, 112  ;;  %vm742_vm8 = vcmp.lt.s32.totalorder %v2594_v25, 111 }
  0x23   : > { %v628_v20 = vpack.c.bf16 %v2556_v18, %v2554_v17  ;;  %v689_v58 = vrot.slane %v2189_v15, %v2539_v10 }
  0x24   : > { %511 = vrot.lane.b32.xlu1 %v472_v7, %s3318_s16  ;;  %509 = vrot.lane.b32.xlu0 %v470_v5, %s3318_s16 }
  0x28   : > { %515 = vrot.lane.b32.xlu1 %v473_v6, %s3318_s16  ;;  %513 = vrot.lane.b32.xlu0 %v471_v4, %s3318_s16 }
  0x2c   : > { %545 = vrot.lane.b32.xlu1 %v472_v7, %s3316_s25  ;;  %543 = vrot.lane.b32.xlu0 %v470_v5, %s3316_s25 }
  0x30   : > { %549 = vrot.lane.b32.xlu1 %v473_v6, %s3316_s25  ;;  %547 = vrot.lane.b32.xlu0 %v471_v4, %s3316_s25 }
  0x34   : > { %579 = vrot.lane.b32.xlu1 %v472_v7, %s3326_s19  ;;  %577 = vrot.lane.b32.xlu0 %v470_v5, %s3326_s19 }
  0x38   : > { %583 = vrot.lane.b32.xlu1 %v473_v6, %s3326_s19  ;;  %581 = vrot.lane.b32.xlu0 %v471_v4, %s3326_s19 }
  0x3c   : > { %634 = vrot.lane.b32.xlu1 %v472_v7, %s3322_s20  ;;  %632 = vrot.lane.b32.xlu0 %v470_v5, %s3322_s20 }
  0x40   : > { %638 = vrot.lane.b32.xlu1 %v473_v6, %s3322_s20  ;;  %636 = vrot.lane.b32.xlu0 %v471_v4, %s3322_s20 }
  0x44   : > { %668 = vrot.lane.b32.xlu1 %v472_v7, %s3314_s21  ;;  %666 = vrot.lane.b32.xlu0 %v470_v5, %s3314_s21 }
  0x48   : > { %672 = vrot.lane.b32.xlu1 %v473_v6, %s3314_s21  ;;  %670 = vrot.lane.b32.xlu0 %v471_v4, %s3314_s21 }
  0x4c   : > { %702 = vrot.lane.b32.xlu1 %v472_v7, %s3312_s22  ;;  %700 = vrot.lane.b32.xlu0 %v470_v5, %s3312_s22 }
  0x50   : > { %706 = vrot.lane.b32.xlu1 %v473_v6, %s3312_s22  ;;  %704 = vrot.lane.b32.xlu0 %v471_v4, %s3312_s22  ;;  %s2421_s22 = smov 119  }
  0x54   : > { %736 = vrot.lane.b32.xlu1 %v472_v7, %s3324_s30  ;;  %734 = vrot.lane.b32.xlu0 %v470_v5, %s3324_s30 }
  0x58   : > { %740 = vrot.lane.b32.xlu1 %v473_v6, %s3324_s30  ;;  %738 = vrot.lane.b32.xlu0 %v471_v4, %s3324_s30 }
  0x5c   : > { %792 = vperm.xlu0 %2332, %v788_v23   ;;  %797 = vperm.xlu1 %2333, %v789_v24  }
  0x8e   : > { %v479_v27 = vpop.permute.xlu1 %478  ;;  %v475_v28 = vpop.permute.xlu0 %474 }
  0x8f   : > { %v487_v31 = vsel %vm484_vm1, %v479_v27, %v475_v28  ;;  %v485_v32 = vsel %vm484_vm1, %v475_v28, %v479_v27  ;;  %v600_v27 = vrot.slane %v2186_v13, %v2539_v10 }
  0x90   : > { %v502_v37 = vmul.f32 %v498_v29, %v485_v32  ;;  %v501_v39 = vmul.f32 %v494_v30, %v487_v31 }
  0x92   : > { %v481_v33 = vpop.permute.xlu1 %480  ;;  %v477_v34 = vpop.permute.xlu0 %476 }
  0x93   : > { %v488_v35 = vsel %vm484_vm1, %v481_v33, %v477_v34  ;;  %v486_v36 = vsel %vm484_vm1, %v477_v34, %v481_v33 }
  0x94   : > { %v504_v38 = vmul.f32 %v498_v29, %v486_v36  ;;  %v503_v40 = vmul.f32 %v494_v30, %v488_v35 }
  0x96   : > { %v512_v42 = vpop.permute.xlu1 %511  ;;  %v510_v43 = vpop.permute.xlu0 %509  ;;  %v506_v44 = vpack.c.bf16 %v504_v38, %v502_v37  ;;  %v505_v45 = vpack.c.bf16 %v503_v40, %v501_v39  ;;  %v2188_v38 = vld [vmem:[%s3309_s11 + $0xa] sm:$0x3] }
  0x98   : > { %813 = vmatprep.subr.bf16.mxu0 %v506_v44  ;;  %v655_v44 = vrot.slane %v2188_v38, %v2539_v10 }
  0x99   : > { %814 = vmatpush1.bf16.msra.mxu0 %v505_v45 }
  0x9a   : > { %v516_v48 = vpop.permute.xlu1 %515  ;;  %v514_v49 = vpop.permute.xlu0 %513 }
  0x9b   : > { %v519_v50 = vsel %vm517_vm2, %v512_v42, %v516_v48  ;;  %v521_v51 = vsel %vm517_vm2, %v516_v48, %v512_v42  ;;  %v518_v52 = vsel %vm517_vm2, %v510_v43, %v514_v49  ;;  %v520_v53 = vsel %vm517_vm2, %v514_v49, %v510_v43 }
  0x9c   : > { %v537_v54 = vmul.f32 %v528_v46, %v521_v51  ;;  %v538_v55 = vmul.f32 %v532_v47, %v519_v50  ;;  %v535_v56 = vmul.f32 %v528_v46, %v520_v53  ;;  %v536_v57 = vmul.f32 %v532_v47, %v518_v52 }
  0x9d   : > { %v651_v43 = vrot.slane %v2188_v38, %v2541_v11 }
  0x9e   : > { %v546_v59 = vpop.permute.xlu1 %545  ;;  %v544_v60 = vpop.permute.xlu0 %543  ;;  %v540_v61 = vpack.c.bf16 %v538_v55, %v536_v57  ;;  %v539_v62 = vpack.c.bf16 %v537_v54, %v535_v56  ;;  %v685_v57 = vrot.slane %v2189_v15, %v2541_v11 }
  0xa0   : > { %815 = vmatprep.subr.bf16.mxu0 %v540_v61 }
  0xa1   : > { %816 = vmatpush1.bf16.msra.mxu0 %v539_v62 }
  0xa2   : > { %v550_v1 = vpop.permute.xlu1 %549  ;;  %v548_v2 = vpop.permute.xlu0 %547 }
  0xa3   : > { %v553_v3 = vsel %vm551_vm3, %v546_v59, %v550_v1  ;;  %v555_v4 = vsel %vm551_vm3, %v550_v1, %v546_v59  ;;  %v552_v5 = vsel %vm551_vm3, %v544_v60, %v548_v2  ;;  %v554_v6 = vsel %vm551_vm3, %v548_v2, %v544_v60  ;;  %v2190_v2 = vld [vmem:[%s3309_s11 + $0xe] sm:$0x3] }
  0xa4   : > { %v571_v7 = vmul.f32 %v562_v63, %v555_v4  ;;  %v572_v8 = vmul.f32 %v566_v0, %v553_v3  ;;  %v569_v9 = vmul.f32 %v562_v63, %v554_v6  ;;  %v570_v12 = vmul.f32 %v566_v0, %v552_v5 }
  0xa6   : > { %v580_v14 = vpop.permute.xlu1 %579  ;;  %v578_v21 = vpop.permute.xlu0 %577  ;;  %v574_v23 = vpack.c.bf16 %v572_v8, %v570_v12  ;;  %v573_v24 = vpack.c.bf16 %v571_v7, %v569_v9  ;;  %v719_v7 = vrot.slane %v2190_v2, %v2541_v11  ;;  %v723_v8 = vrot.slane %v2190_v2, %v2539_v10  ;;  %v2339_v2 = vld [vmem:[%s3301_s3 + $0x4] ss:$8 sps:$4 sm:$0xff]  }
  0xa7   : > { %2205 = vmatprep.mubr.msk.bf16.mxu1 %vm809_vm0, %v2339_v2 }
  0xa8   : > { %817 = vmatprep.subr.bf16.mxu0 %v574_v23 }
  0xa9   : > { %818 = vmatpush1.bf16.msra.mxu0 %v573_v24 }
  0xaa   : > { %v584_v28 = vpop.permute.xlu1 %583  ;;  %v582_v29 = vpop.permute.xlu0 %581 }
  0xab   : > { %v587_v30 = vsel %vm585_vm4, %v580_v14, %v584_v28  ;;  %v589_v31 = vsel %vm585_vm4, %v584_v28, %v580_v14  ;;  %v586_v32 = vsel %vm585_vm4, %v578_v21, %v582_v29  ;;  %v588_v33 = vsel %vm585_vm4, %v582_v29, %v578_v21  ;;  %v2191_v29 = vld [vmem:[%s3309_s11 + $0x10] sm:$0x3] }
  0xac   : > { %v605_v34 = vmul.f32 %v596_v26, %v589_v31  ;;  %v606_v35 = vmul.f32 %v600_v27, %v587_v30  ;;  %v603_v36 = vmul.f32 %v596_v26, %v588_v33  ;;  %v604_v37 = vmul.f32 %v600_v27, %v586_v32 }
  0xae   : > { %v635_v39 = vpop.permute.xlu1 %634  ;;  %v633_v40 = vpop.permute.xlu0 %632  ;;  %v608_v41 = vpack.c.bf16 %v606_v35, %v604_v37  ;;  %v607_v42 = vpack.c.bf16 %v605_v34, %v603_v36  ;;  %v753_v34 = vrot.slane %v2191_v29, %v2541_v11  ;;  %v757_v35 = vrot.slane %v2191_v29, %v2539_v10 }
  0xb0   : > { %819 = vmatprep.subr.bf16.mxu0 %v608_v41 }
  0xb1   : > { %820 = vmatpush1.bf16.msra.mxu0 %v607_v42 }
  0xb2   : > { %v639_v45 = vpop.permute.xlu1 %638  ;;  %v637_v46 = vpop.permute.xlu0 %636  ;;  %821 = vmatprep.subr.bf16.mxu0 %v629_v19 }
  0xb3   : > { %v642_v47 = vsel %vm640_vm5, %v635_v39, %v639_v45  ;;  %v644_v48 = vsel %vm640_vm5, %v639_v45, %v635_v39  ;;  %v641_v49 = vsel %vm640_vm5, %v633_v40, %v637_v46  ;;  %v643_v50 = vsel %vm640_vm5, %v637_v46, %v633_v40 }
  0xb4   : > { %v660_v51 = vmul.f32 %v651_v43, %v642_v47  ;;  %v661_v52 = vmul.f32 %v655_v44, %v644_v48  ;;  %v658_v53 = vmul.f32 %v651_v43, %v641_v49  ;;  %v659_v54 = vmul.f32 %v655_v44, %v643_v50  ;;  %v2334_v48 = vld [vmem:[%s3299_s1] ss:$8 sps:$4 sm:$0xff]  }
  0xb5   : > { %822 = vmatpush1.bf16.msra.mxu0 %v628_v20 }
  0xb6   : > { %v669_v16 = vpop.permute.xlu1 %668  ;;  %v667_v19 = vpop.permute.xlu0 %666  ;;  %v663_v55 = vpack.c.bf16 %v661_v52, %v659_v54  ;;  %v662_v56 = vpack.c.bf16 %v660_v51, %v658_v53  ;;  %v2198_v52 = vld [vmem:[%s3309_s11 + $0x8] sm:$0x3] }
  0xb8   : > { %823 = vmatprep.subr.bf16.mxu0 %v663_v55 }
  0xb9   : > { %824 = vmatpush1.bf16.msra.mxu0 %v662_v56 }
  0xba   : > { %v673_v59 = vpop.permute.xlu1 %672  ;;  %v671_v60 = vpop.permute.xlu0 %670 }
  0xbb   : > { %v676_v17 = vsel %vm674_vm6, %v669_v16, %v673_v59  ;;  %v678_v18 = vsel %vm674_vm6, %v673_v59, %v669_v16  ;;  %v675_v20 = vsel %vm674_vm6, %v667_v19, %v671_v60  ;;  %v677_v61 = vsel %vm674_vm6, %v671_v60, %v667_v19 }
  0xbc   : > { %v694_v62 = vmul.f32 %v685_v57, %v676_v17  ;;  %v695_v63 = vmul.f32 %v689_v58, %v678_v18  ;;  %v692_v0 = vmul.f32 %v685_v57, %v675_v20  ;;  %v693_v1 = vmul.f32 %v689_v58, %v677_v61 }
  0xbd   : > { %v993_v57 = vrot.slane %v2198_v52, %v2541_v11  ;;  %v997_v60 = vrot.slane %v2198_v52, %v2539_v10 }
  0xbe   : > { %v703_v3 = vpop.permute.xlu1 %702  ;;  %v701_v4 = vpop.permute.xlu0 %700  ;;  %v697_v5 = vpack.c.bf16 %v695_v63, %v693_v1  ;;  %v696_v6 = vpack.c.bf16 %v694_v62, %v692_v0 }
  0xc0   : > { %825 = vmatprep.subr.bf16.mxu0 %v697_v5  ;;  %v2340_v5 = vld [vmem:[%s3307_s9 + $0x40] sm:$0xff]  }
  0xc1   : > { %826 = vmatpush1.bf16.msra.mxu0 %v696_v6  ;;  %v2341_v6 = vld [vmem:[%s3307_s9] sm:$0xff]  }
  0xc2   : > { %v707_v9 = vpop.permute.xlu1 %706  ;;  %v705_v12 = vpop.permute.xlu0 %704 }
  0xc3   : > { %v710_v13 = vsel %vm708_vm7, %v703_v3, %v707_v9  ;;  %v712_v14 = vsel %vm708_vm7, %v707_v9, %v703_v3  ;;  %v709_v21 = vsel %vm708_vm7, %v701_v4, %v705_v12  ;;  %v711_v23 = vsel %vm708_vm7, %v705_v12, %v701_v4  ;;  %v1156_v3 = vld [vmem:[%s3302_s4] sm:$0xff]  ;;  %v1157_v4 = vld [vmem:[%s3302_s4 + $0x8] sm:$0xff]  ;;  %v2344_v9 = vld [vmem:[%s3307_s9 + $0x50] sm:$0xff]  }
  0xc4   : > { %v728_v24 = vmul.f32 %v719_v7, %v710_v13  ;;  %v729_v26 = vmul.f32 %v723_v8, %v712_v14  ;;  %v726_v27 = vmul.f32 %v719_v7, %v709_v21  ;;  %v727_v28 = vmul.f32 %v723_v8, %v711_v23  ;;  %v2342_v7 = vld [vmem:[%s3307_s9 + $0x48] sm:$0xff]   ;;  %v2345_v12 = vld [vmem:[%s3307_s9 + $0x10] sm:$0xff]   ;;  %v2346_v13 = vld [vmem:[%s3307_s9 + $0x58] sm:$0xff]  }
  0xc5   : > { %v2343_v8 = vld [vmem:[%s3307_s9 + $0x8] sm:$0xff]   ;;  %v2347_v14 = vld [vmem:[%s3307_s9 + $0x18] sm:$0xff]   ;;  %v2348_v21 = vld [vmem:[%s3307_s9 + $0x60] sm:$0xff]  }
  0xc6   : > { %v737_v30 = vpop.permute.xlu1 %736  ;;  %v735_v31 = vpop.permute.xlu0 %734  ;;  %v731_v32 = vpack.c.bf16 %v729_v26, %v727_v28  ;;  %v730_v33 = vpack.c.bf16 %v728_v24, %v726_v27  ;;  %v2349_v23 = vld [vmem:[%s3307_s9 + $0x20] sm:$0xff]   ;;  %v2350_v24 = vld [vmem:[%s3307_s9 + $0x68] sm:$0xff]  }
  0xc7   : > { %v2351_v26 = vld [vmem:[%s3307_s9 + $0x28] sm:$0xff]  }
  0xc8   : > { %827 = vmatprep.subr.bf16.mxu0 %v731_v32 }
  0xc9   : > { %828 = vmatpush1.bf16.msra.mxu0 %v730_v33 }
  0xca   : > { %v741_v36 = vpop.permute.xlu1 %740  ;;  %v739_v37 = vpop.permute.xlu0 %738 }
  0xcb   : > { %v744_v38 = vsel %vm742_vm8, %v737_v30, %v741_v36  ;;  %v746_v39 = vsel %vm742_vm8, %v741_v36, %v737_v30  ;;  %v743_v40 = vsel %vm742_vm8, %v735_v31, %v739_v37  ;;  %v745_v41 = vsel %vm742_vm8, %v739_v37, %v735_v31 }
  0xcc   : > { %v762_v42 = vmul.f32 %v753_v34, %v744_v38  ;;  %v763_v43 = vmul.f32 %v757_v35, %v746_v39  ;;  %v760_v44 = vmul.f32 %v753_v34, %v743_v40  ;;  %v761_v45 = vmul.f32 %v757_v35, %v745_v41  ;;  %v872_v40 = vld [vmem:[%s3309_s11] sm:$0x3] }
  0xce   : > { %v765_v46 = vpack.c.bf16 %v763_v43, %v761_v45  ;;  %v764_v47 = vpack.c.bf16 %v762_v42, %v760_v44  ;;  %v877_v42 = vrot.slane %v872_v40, %v2541_v11  ;;  %v2195_v44 = vld [vmem:[%s3309_s11 + $0x2] sm:$0x3]  ;;  %v881_v45 = vrot.slane %v872_v40, %v2539_v10 }
  0xcf   : > { %v913_v52 = vrot.slane %v2195_v44, %v2539_v10 }
  0xd0   : > { %829 = vmatprep.subr.bf16.mxu0 %v765_v46 }
  0xd1   : > { %830 = vmatpush1.bf16.msra.mxu0 %v764_v47 }
  0xd2   : > { %2271 = vmatprep.subr.bf16.mxu0 %v2340_v5 }
  0xd4   : > { %846 = vmatmul.mubr.bf16.vlgmr.msra.gmra.mrb[0].mxu0 %v2334_v48 }
  0xd5   : > { %2272 = vmatpush3.bf16.msra.mxu0 %v2341_v6 }
  0xd6   : > { %2273 = vmatprep.subr.bf16.mxu0 %v2342_v7 }
  0xd9   : > { %2274 = vmatpush3.bf16.msra.mxu0 %v2343_v8 }
  0xda   : > { %2275 = vmatprep.subr.bf16.mxu0 %v2344_v9  ;;  %v2197_v9 = vld [vmem:[%s3309_s11 + $0x6] sm:$0x3] }
  0xdb   : > { %v793_v49 = vpop.permute.xlu0 %792  ;;  %v798_v51 = vpop.permute.xlu1 %797 }
  0xdd   : > { %2276 = vmatpush3.bf16.msra.mxu0 %v2345_v12 }
  0xde   : > { %2277 = vmatprep.subr.bf16.mxu0 %v2346_v13 }
  0xe1   : > { %2278 = vmatpush3.bf16.msra.mxu0 %v2347_v14 }
  0xe2   : > { %2279 = vmatprep.subr.bf16.mxu0 %v2348_v21 }
  0xe5   : > { %2280 = vmatpush3.bf16.msra.mxu0 %v2349_v23 }
  0xe6   : > { %2281 = vmatprep.subr.bf16.mxu0 %v2350_v24 }
  0xe9   : > { %2282 = vmatpush3.bf16.msra.mxu0 %v2351_v26 }
 0x1a7   : > { %v847_v50 = vpop.f32.mrb[0].mxu0 }
 0x1a8   : > { %v848_v53 = vadd.f32 %v847_v50, %v793_v49  ;;  %v849_v54 = vpop.f32.mrb[1].mxu0 }
 0x1a9   : > { %v850_v15 = vadd.f32 %v849_v54, %v793_v49  ;;  %v851_v16 = vpop.f32.mrb[2].mxu0 }
 0x1aa   : > { %v856_v19 = vmax.f32 %v848_v53, 0.0  ;;  %v852_v55 = vadd.f32 %v851_v16, %v798_v51  ;;  %v853_v56 = vpop.f32.mrb[3].mxu0 }
 0x1ab   : > { %v857_v58 = vmax.f32 %v850_v15, 0.0  ;;  %v854_v59 = vadd.f32 %v853_v56, %v798_v51  ;;  %v909_v51 = vrot.slane %v2195_v44, %v2541_v11 }
 0x1ac   : > { %v858_v17 = vmax.f32 %v852_v55, 0.0  ;;  %860 = vrot.lane.b32.xlu1 %v856_v19, %s3320_s14  ;;  %v2724_v20 = vmul.f32 %v993_v57, %v856_v19  ;;  %v2196_v55 = vld [vmem:[%s3309_s11 + $0x4] sm:$0x3] }
 0x1ad   : > { %v859_v18 = vmax.f32 %v854_v59, 0.0  ;;  %v2728_v62 = vmul.f32 %v997_v60, %v857_v58  ;;  %v941_v2 = vrot.slane %v2196_v55, %v2541_v11 }
 0x1ae   : > { %862 = vrot.lane.b32.xlu0 %v858_v17, %s3320_s14  ;;  %v2726_v61 = vmul.f32 %v993_v57, %v858_v17 }
 0x1af   : > { %v2730_v63 = vmul.f32 %v997_v60, %v859_v18 }
 0x1b0   : > { %892 = vrot.lane.b32.xlu1 %v856_v19, %s3318_s16  ;;  %v1004_v0 = vpack.c.bf16 %v2726_v61, %v2724_v20 }
 0x1b1   : > { %v1005_v1 = vpack.c.bf16 %v2730_v63, %v2728_v62  ;;  %v2201_v62 = vld [vmem:[%s3309_s11 + $0xe] sm:$0x3] }
 0x1b2   : > { %894 = vrot.lane.b32.xlu0 %v858_v17, %s3318_s16 }
 0x1b4   : > { %924 = vrot.lane.b32.xlu1 %v856_v19, %s3316_s25 }
 0x1b6   : > { %926 = vrot.lane.b32.xlu0 %v858_v17, %s3316_s25 }
 0x1b8   : > { %956 = vrot.lane.b32.xlu1 %v856_v19, %s3326_s19 }
 0x1ba   : > { %958 = vrot.lane.b32.xlu0 %v858_v17, %s3326_s19 }
 0x1bc   : > { %1008 = vrot.lane.b32.xlu1 %v856_v19, %s3322_s20 }
 0x1be   : > { %1010 = vrot.lane.b32.xlu0 %v858_v17, %s3322_s20 }
 0x1c0   : > { %1040 = vrot.lane.b32.xlu1 %v856_v19, %s3314_s21 }
 0x1c2   : > { %1042 = vrot.lane.b32.xlu0 %v858_v17, %s3314_s21 }
 0x1c4   : > { %1072 = vrot.lane.b32.xlu1 %v856_v19, %s3328_s28 }
 0x1c6   : > { %1074 = vrot.lane.b32.xlu0 %v858_v17, %s3328_s28 }
 0x1c8   : > { %864 = vrot.lane.b32.xlu1 %v857_v58, %s3320_s14 }
 0x1ca   : > { %866 = vrot.lane.b32.xlu0 %v859_v18, %s3320_s14  ;;  %s2416_s14 = smov 9  }
 0x1cc   : > { %896 = vrot.lane.b32.xlu1 %v857_v58, %s3318_s16 }
 0x1ce   : > { %898 = vrot.lane.b32.xlu0 %v859_v18, %s3318_s16 }
 0x1d0   : > { %928 = vrot.lane.b32.xlu1 %v857_v58, %s3316_s25 }
 0x1d2   : > { %930 = vrot.lane.b32.xlu0 %v859_v18, %s3316_s25  ;;  %s2417_s25 = smov 8  }
 0x1d4   : > { %960 = vrot.lane.b32.xlu1 %v857_v58, %s3326_s19 }
 0x1d6   : > { %962 = vrot.lane.b32.xlu0 %v859_v18, %s3326_s19 }
 0x1d8   : > { %1104 = vrot.lane.b32.xlu1 %v856_v19, %s3324_s30 }
 0x1da   : > { %1106 = vrot.lane.b32.xlu0 %v858_v17, %s3324_s30 }
 0x1dc   : > { %1012 = vrot.lane.b32.xlu1 %v857_v58, %s3322_s20 }
 0x1de   : > { %1014 = vrot.lane.b32.xlu0 %v859_v18, %s3322_s20  ;;  %s2418_s20 = smov 7  }
 0x1e0   : > { %1044 = vrot.lane.b32.xlu1 %v857_v58, %s3314_s21 }
 0x1e2   : > { %1046 = vrot.lane.b32.xlu0 %v859_v18, %s3314_s21 }
 0x1e4   : > { %1076 = vrot.lane.b32.xlu1 %v857_v58, %s3328_s28 }
 0x1e6   : > { %1078 = vrot.lane.b32.xlu0 %v859_v18, %s3328_s28 }
 0x1e8   : > { %1108 = vrot.lane.b32.xlu1 %v857_v58, %s3324_s30 }
 0x1ea   : > { %1110 = vrot.lane.b32.xlu0 %v859_v18, %s3324_s30  ;;  %s3332_s30 = smov 15  }
 0x1ec   : > { %1160 = vperm.xlu1 %2333, %v1156_v3   ;;  %v945_v3 = vrot.slane %v2196_v55, %v2539_v10 }
 0x1ee   : > { %1165 = vperm.xlu0 %2332, %v1157_v4  }
 0x21e   : > { %v861_v27 = vpop.permute.xlu1 %860 }
 0x220   : > { %v863_v28 = vpop.permute.xlu0 %862 }
 0x222   : > { %v893_v29 = vpop.permute.xlu1 %892 }
 0x224   : > { %v895_v30 = vpop.permute.xlu0 %894 }
 0x226   : > { %v925_v31 = vpop.permute.xlu1 %924 }
 0x228   : > { %v927_v32 = vpop.permute.xlu0 %926 }
 0x22a   : > { %v957_v33 = vpop.permute.xlu1 %956 }
 0x22c   : > { %v2812_v34 = vpop.permute.xlu0 %958 }
 0x22e   : > { %v2814_v35 = vpop.permute.xlu1 %1008 }
 0x230   : > { %v2816_v36 = vpop.permute.xlu0 %1010 }
 0x232   : > { %v2818_v37 = vpop.permute.xlu1 %1040 }
 0x234   : > { %v2820_v38 = vpop.permute.xlu0 %1042 }
 0x236   : > { %v2822_v39 = vpop.permute.xlu1 %1072 }
 0x238   : > { %v2827_v41 = vpop.permute.xlu0 %1074 }
 0x23a   : > { %v865_v43 = vpop.permute.xlu1 %864 }
 0x23b   : > { %v868_v46 = vsel %vm484_vm1, %v861_v27, %v865_v43  ;;  %v870_v47 = vsel %vm484_vm1, %v865_v43, %v861_v27  ;;  %v973_v27 = vrot.slane %v2197_v9, %v2541_v11 }
 0x23c   : > { %v867_v48 = vpop.permute.xlu0 %866  ;;  %v884_v53 = vmul.f32 %v877_v42, %v870_v47  ;;  %v885_v16 = vmul.f32 %v881_v45, %v868_v46 }
 0x23d   : > { %v869_v49 = vsel %vm484_vm1, %v863_v28, %v867_v48  ;;  %v871_v50 = vsel %vm484_vm1, %v867_v48, %v863_v28  ;;  %v977_v28 = vrot.slane %v2197_v9, %v2539_v10 }
 0x23e   : > { %v886_v54 = vmul.f32 %v877_v42, %v871_v50  ;;  %v897_v15 = vpop.permute.xlu1 %896  ;;  %v887_v19 = vmul.f32 %v881_v45, %v869_v49 }
 0x23f   : > { %v900_v56 = vsel %vm517_vm2, %v893_v29, %v897_v15  ;;  %v902_v57 = vsel %vm517_vm2, %v897_v15, %v893_v29 }
 0x240   : > { %v899_v58 = vpop.permute.xlu0 %898  ;;  %v889_v59 = vpack.c.bf16 %v887_v19, %v885_v16  ;;  %v888_v60 = vpack.c.bf16 %v886_v54, %v884_v53  ;;  %v916_v4 = vmul.f32 %v909_v51, %v902_v57  ;;  %v917_v5 = vmul.f32 %v913_v52, %v900_v56  ;;  %v2200_v56 = vld [vmem:[%s3309_s11 + $0xc] sm:$0x3] }
 0x241   : > { %v901_v17 = vsel %vm517_vm2, %v895_v30, %v899_v58  ;;  %v903_v18 = vsel %vm517_vm2, %v899_v58, %v895_v30 }
 0x242   : > { %v918_v6 = vmul.f32 %v909_v51, %v903_v18  ;;  %v919_v7 = vmul.f32 %v913_v52, %v901_v17  ;;  %1180 = vmatprep.subr.bf16.mxu1 %v889_v59  ;;  %v929_v8 = vpop.permute.xlu1 %928  ;;  %v1057_v18 = vrot.slane %v2200_v56, %v2541_v11 }
 0x243   : > { %v932_v12 = vsel %vm551_vm3, %v925_v31, %v929_v8  ;;  %v934_v13 = vsel %vm551_vm3, %v929_v8, %v925_v31  ;;  %1181 = vmatpush1.bf16.msra.mxu1 %v888_v60 }
 0x244   : > { %v931_v14 = vpop.permute.xlu0 %930  ;;  %v921_v21 = vpack.c.bf16 %v919_v7, %v917_v5  ;;  %v920_v23 = vpack.c.bf16 %v918_v6, %v916_v4  ;;  %v948_v29 = vmul.f32 %v941_v2, %v934_v13  ;;  %v949_v30 = vmul.f32 %v945_v3, %v932_v12 }
 0x245   : > { %v933_v24 = vsel %vm551_vm3, %v927_v32, %v931_v14  ;;  %v935_v26 = vsel %vm551_vm3, %v931_v14, %v927_v32  ;;  %v1089_v13 = vrot.slane %v2201_v62, %v2541_v11  ;;  %v1093_v14 = vrot.slane %v2201_v62, %v2539_v10 }
 0x246   : > { %v950_v40 = vmul.f32 %v941_v2, %v935_v26  ;;  %v951_v42 = vmul.f32 %v945_v3, %v933_v24  ;;  %1182 = vmatprep.subr.bf16.mxu1 %v921_v21  ;;  %v961_v31 = vpop.permute.xlu1 %960  ;;  %v1061_v2 = vrot.slane %v2200_v56, %v2539_v10  ;;  %v2355_v56 = vld [vmem:[%s3307_s9 + $0x38] sm:$0xff]  }
 0x247   : > { %v964_v43 = vsel %vm585_vm4, %v957_v33, %v961_v31  ;;  %v966_v44 = vsel %vm585_vm4, %v961_v31, %v957_v33  ;;  %1183 = vmatpush1.bf16.msra.mxu1 %v920_v23  ;;  %v2199_v33 = vld [vmem:[%s3309_s11 + $0xa] sm:$0x3] }
 0x248   : > { %v963_v45 = vpop.permute.xlu0 %962  ;;  %v953_v46 = vpack.c.bf16 %v951_v42, %v949_v30  ;;  %v952_v32 = vpack.c.bf16 %v950_v40, %v948_v29  ;;  %v980_v49 = vmul.f32 %v973_v27, %v966_v44  ;;  %v981_v50 = vmul.f32 %v977_v28, %v964_v43 }
 0x249   : > { %v965_v47 = vsel %vm585_vm4, %v2812_v34, %v963_v45  ;;  %v967_v48 = vsel %vm585_vm4, %v963_v45, %v2812_v34  ;;  %v1025_v19 = vrot.slane %v2199_v33, %v2541_v11  ;;  %v1029_v34 = vrot.slane %v2199_v33, %v2539_v10 }
 0x24a   : > { %v982_v51 = vmul.f32 %v973_v27, %v967_v48  ;;  %v983_v52 = vmul.f32 %v977_v28, %v965_v47  ;;  %1184 = vmatprep.subr.bf16.mxu1 %v953_v46  ;;  %v1105_v53 = vpop.permute.xlu1 %1104 }
 0x24b   : > { %1185 = vmatpush1.bf16.msra.mxu1 %v952_v32 }
 0x24c   : > { %v2883_v54 = vpop.permute.xlu0 %1106  ;;  %v985_v15 = vpack.c.bf16 %v983_v52, %v981_v50  ;;  %v984_v16 = vpack.c.bf16 %v982_v51, %v980_v49 }
 0x24e   : > { %1186 = vmatprep.subr.bf16.mxu1 %v985_v15  ;;  %v1013_v55 = vpop.permute.xlu1 %1012 }
 0x24f   : > { %v1016_v57 = vsel %vm640_vm5, %v2814_v35, %v1013_v55  ;;  %v1018_v58 = vsel %vm640_vm5, %v1013_v55, %v2814_v35  ;;  %1187 = vmatpush1.bf16.msra.mxu1 %v984_v16  ;;  %v2354_v55 = vld [vmem:[%s3307_s9 + $0x78] sm:$0xff]  }
 0x250   : > { %v1015_v59 = vpop.permute.xlu0 %1014  ;;  %1188 = vmatprep.subr.bf16.mxu1 %v1005_v1  ;;  %v1032_v3 = vmul.f32 %v1025_v19, %v1016_v57  ;;  %v1033_v35 = vmul.f32 %v1029_v34, %v1018_v58 }
 0x251   : > { %v1017_v60 = vsel %vm640_vm5, %v2816_v36, %v1015_v59  ;;  %v1019_v17 = vsel %vm640_vm5, %v1015_v59, %v2816_v36 }
 0x252   : > { %v1034_v4 = vmul.f32 %v1025_v19, %v1017_v60  ;;  %v1035_v5 = vmul.f32 %v1029_v34, %v1019_v17  ;;  %v1045_v6 = vpop.permute.xlu1 %1044  ;;  %v2337_v19 = vld [vmem:[%s3301_s3] ss:$8 sps:$4 sm:$0xff]   ;;  %v2353_v34 = vld [vmem:[%s3307_s9 + $0x30] sm:$0xff]  }
 0x253   : > { %v1048_v63 = vsel %vm674_vm6, %v2818_v37, %v1045_v6  ;;  %v1050_v1 = vsel %vm674_vm6, %v1045_v6, %v2818_v37  ;;  %1189 = vmatpush1.bf16.msra.mxu1 %v1004_v0  ;;  %v2202_v0 = vld [vmem:[%s3309_s11 + $0x10] sm:$0x3] }
 0x254   : > { %v1047_v36 = vpop.permute.xlu0 %1046  ;;  %v1037_v7 = vpack.c.bf16 %v1035_v5, %v1033_v35  ;;  %v1036_v8 = vpack.c.bf16 %v1034_v4, %v1032_v3  ;;  %v1064_v37 = vmul.f32 %v1057_v18, %v1048_v63  ;;  %v1065_v21 = vmul.f32 %v1061_v2, %v1050_v1 }
 0x255   : > { %v1049_v9 = vsel %vm674_vm6, %v2820_v38, %v1047_v36  ;;  %v1051_v12 = vsel %vm674_vm6, %v1047_v36, %v2820_v38  ;;  %v1121_v40 = vrot.slane %v2202_v0, %v2541_v11  ;;  %v1125_v42 = vrot.slane %v2202_v0, %v2539_v10  ;;  %v2364_v0 = vld [vmem:[%s3308_s10 + $0x14] ss:$8 sps:$4 sm:$0xff]  }
 0x256   : > { %v1066_v23 = vmul.f32 %v1057_v18, %v1049_v9  ;;  %v1067_v20 = vmul.f32 %v1061_v2, %v1051_v12  ;;  %v1077_v61 = vpop.permute.xlu1 %1076  ;;  %1190 = vmatprep.subr.bf16.mxu1 %v1037_v7 }
 0x257   : > { %v1080_v24 = vsel %vm708_vm7, %v2822_v39, %v1077_v61  ;;  %v1082_v38 = vsel %vm708_vm7, %v1077_v61, %v2822_v39  ;;  %1191 = vmatpush1.bf16.msra.mxu1 %v1036_v8  ;;  %v2230_v8 = vld [vmem:[%s3310_s12 + $0x4] ss:$0 sm:$0xff] }
 0x258   : > { %v1079_v26 = vpop.permute.xlu0 %1078  ;;  %v1069_v27 = vpack.c.bf16 %v1067_v20, %v1065_v21  ;;  %v1068_v28 = vpack.c.bf16 %v1066_v23, %v1064_v37  ;;  %v1096_v31 = vmul.f32 %v1089_v13, %v1080_v24  ;;  %v1097_v43 = vmul.f32 %v1093_v14, %v1082_v38  ;;  %v2356_v37 = vld [vmem:[%s3303_s5 + $0x4] ss:$8 sps:$4 sm:$0xff]   ;;  %v2359_v20 = vld [vmem:[%s3308_s10] ss:$8 sps:$4 sm:$0xff]   ;;  %v2362_v24 = vld [vmem:[%s3308_s10 + $0x10] ss:$8 sps:$4 sm:$0xff]  }
 0x259   : > { %v1081_v29 = vsel %vm708_vm7, %v2827_v41, %v1079_v26  ;;  %v1083_v30 = vsel %vm708_vm7, %v1079_v26, %v2827_v41  ;;  %v1544_v21 = vld [vmem:[%s3304_s6] sm:$0xff]  ;;  %v1545_v23 = vld [vmem:[%s3304_s6 + $0x8] sm:$0xff] }
 0x25a   : > { %v1098_v44 = vmul.f32 %v1089_v13, %v1081_v29  ;;  %v1099_v39 = vmul.f32 %v1093_v14, %v1083_v30  ;;  %v1109_v45 = vpop.permute.xlu1 %1108  ;;  %1192 = vmatprep.subr.bf16.mxu1 %v1069_v27  ;;  %v2361_v61 = vld [vmem:[%s3308_s10 + $0x4] ss:$8 sps:$4 sm:$0xff]   ;;  %v2365_v26 = vld [vmem:[%s3308_s10 + $0x20] ss:$8 sps:$4 sm:$0xff]   ;;  %v2370_v27 = vld [vmem:[%s3308_s10 + $0x34] ss:$8 sps:$4 sm:$0xff]  }
 0x25b   : > { %v1112_v46 = vsel %vm742_vm8, %v1105_v53, %v1109_v45  ;;  %v1114_v32 = vsel %vm742_vm8, %v1109_v45, %v1105_v53  ;;  %1193 = vmatpush1.bf16.msra.mxu1 %v1068_v28  ;;  %v2367_v38 = vld [vmem:[%s3308_s10 + $0x24] ss:$8 sps:$4 sm:$0xff]   ;;  %v2368_v28 = vld [vmem:[%s3308_s10 + $0x30] ss:$8 sps:$4 sm:$0xff]   ;;  %v2371_v30 = vld [vmem:[%s3308_s10 + $0x40] ss:$8 sps:$4 sm:$0xff]  }
 0x25c   : > { %v1111_v47 = vpop.permute.xlu0 %1110  ;;  %v1101_v48 = vpack.c.bf16 %v1099_v39, %v1097_v43  ;;  %v1100_v41 = vpack.c.bf16 %v1098_v44, %v1096_v31  ;;  %v1128_v51 = vmul.f32 %v1121_v40, %v1112_v46  ;;  %v1129_v52 = vmul.f32 %v1125_v42, %v1114_v32  ;;  %v2373_v29 = vld [vmem:[%s3308_s10 + $0x44] ss:$8 sps:$4 sm:$0xff]   ;;  %v2222_v31 = vld [vmem:[%s3310_s12] ss:$0 sm:$0xff]  ;;  %v2224_v46 = vld [vmem:[%s3310_s12 + $0x1] ss:$0 sm:$0xff] }
 0x25d   : > { %v1113_v49 = vsel %vm742_vm8, %v2883_v54, %v1111_v47  ;;  %v1115_v50 = vsel %vm742_vm8, %v1111_v47, %v2883_v54  ;;  %v2352_v54 = vld [vmem:[%s3307_s9 + $0x70] sm:$0xff]  }
 0x25e   : > { %v1130_v33 = vmul.f32 %v1121_v40, %v1113_v49  ;;  %v1131_v15 = vmul.f32 %v1125_v42, %v1115_v50  ;;  %1194 = vmatprep.subr.bf16.mxu1 %v1101_v48  ;;  %2283 = vmatprep.subr.bf16.mxu0 %v2352_v54  ;;  %v2376_v40 = vld [vmem:[%s3308_s10 + $0x54] ss:$8 sps:$4 sm:$0xff]   ;;  %v2374_v42 = vld [vmem:[%s3308_s10 + $0x50] ss:$8 sps:$4 sm:$0xff]   ;;  %v2226_v50 = vld [vmem:[%s3310_s12 + $0x2] ss:$0 sm:$0xff] }
 0x25f   : > { %1195 = vmatpush1.bf16.msra.mxu1 %v1100_v41  ;;  %2284 = vmatpush3.bf16.msra.mxu0 %v2353_v34 }
 0x260   : > { %v1133_v16 = vpack.c.bf16 %v1131_v15, %v1129_v52  ;;  %v1132_v53 = vpack.c.bf16 %v1130_v33, %v1128_v51  ;;  %2285 = vmatprep.subr.bf16.mxu0 %v2354_v55 }
 0x262   : > { %1196 = vmatprep.subr.bf16.mxu1 %v1133_v16 }
 0x263   : > { %1197 = vmatpush1.bf16.msra.mxu1 %v1132_v53  ;;  %2286 = vmatpush3.bf16.msra.mxu0 %v2355_v56  ;;  %v2228_v53 = vld [vmem:[%s3310_s12 + $0x3] ss:$0 sm:$0xff] }
 0x264   : > { %1568 = vmatprep.subr.bf16.mxu1 %v2415_v22  ;;  %1708 = vmatprep.subr.bf16.mxu0 %v2361_v61  ;;  %v2379_v61 = vld [vmem:[%s3308_s10 + $0x64] ss:$8 sps:$4 sm:$0xff]  }
 0x266   : > { %1213 = vmatmul.mubr.bf16.vlgmr.msra.gmra.mrb[0].mxu1 %v2337_v19 }
 0x267   : > { %2241 = vmatprep.mubr.msk.bf16.mxu1 %vm809_vm0, %v2356_v37 }
 0x26b   : > { %v1161_v58 = vpop.permute.xlu1 %1160 }
 0x26d   : > { %v1166_v60 = vpop.permute.xlu0 %1165 }
 0x339   : > { %v1214_v57 = vpop.f32.mrb[0].mxu1 }
 0x33a   : > { %v1216_v59 = vpop.f32.mrb[1].mxu1  ;;  %v1215_v18 = vadd.f32 %v1214_v57, %v1161_v58 }
 0x33b   : > { %v1218_v17 = vpop.f32.mrb[2].mxu1  ;;  %v1217_v35 = vadd.f32 %v1216_v59, %v1161_v58 }
 0x33c   : > { %v1219_v2 = vadd.f32 %v1218_v17, %v1166_v60  ;;  %v1220_v3 = vpop.f32.mrb[3].mxu1 }
 0x33d   : > { %v1221_v4 = vadd.f32 %v1220_v3, %v1166_v60  ;;  %v2232_v60 = vld [vmem:[%s3310_s12 + $0x5] ss:$0 sm:$0xff] }
 0x33e   : > { %v1223_v5 = vpack.c.bf16 %v1219_v2, %v1215_v18 }
 0x33f   : > { %v1224_v6 = vpack.c.bf16 %v1221_v4, %v1217_v35  ;;  %v2234_v35 = vld [vmem:[%s3310_s12 + $0x6] ss:$0 sm:$0xff] }
 0x341   : > { %1385 = vmatprep.mubr.bf16.mxu0 %v1224_v6 }
 0x342   : > { %1386 = vmatmul.mubr.bf16.vlgmr.msra.gmra.mrb[4].mxu0 %v1223_v5 }
 0x343   : > { %1740 = vmatprep.mubr.bf16.mxu0 %v2415_v22  ;;  %1709 = vmatpush1.bf16.msra.mxu0 %v2359_v20  ;;  %v2358_v20 = vld [vmem:[%s3303_s5] ss:$8 sps:$4 sm:$0xff]  }
 0x344   : > { %1710 = vmatprep.subr.bf16.mxu0 %v2364_v0  ;;  %v2377_v0 = vld [vmem:[%s3308_s10 + $0x60] ss:$8 sps:$4 sm:$0xff]  }
 0x347   : > { %1711 = vmatpush1.bf16.msra.mxu0 %v2362_v24  ;;  %v2380_v24 = vld [vmem:[%s3308_s10 + $0x70] ss:$8 sps:$4 sm:$0xff]  }
 0x348   : > { %1712 = vmatprep.subr.bf16.mxu0 %v2367_v38 }
 0x34b   : > { %1713 = vmatpush1.bf16.msra.mxu0 %v2365_v26 }
 0x34c   : > { %1714 = vmatprep.subr.bf16.mxu0 %v2370_v27 }
 0x34f   : > { %1715 = vmatpush1.bf16.msra.mxu0 %v2368_v28 }
 0x350   : > { %1716 = vmatprep.subr.bf16.mxu0 %v2373_v29 }
 0x353   : > { %1717 = vmatpush1.bf16.msra.mxu0 %v2371_v30 }
 0x354   : > { %1718 = vmatprep.subr.bf16.mxu0 %v2376_v40 }
 0x357   : > { %1719 = vmatpush1.bf16.msra.mxu0 %v2374_v42 }
 0x358   : > { %1720 = vmatprep.subr.bf16.mxu0 %v2379_v61 }
 0x35b   : > { %1721 = vmatpush1.bf16.msra.mxu0 %v2377_v0  ;;  %v2259_v0 = vld [vmem:[%s3309_s11 + $0x4] sm:$0x3] }
 0x415   : > { %v2287_v62 = vpop.f32.mrb[4].mxu0 }
 0x416   : > { %v2288_v63 = vpop.f32.mrb[5].mxu0 }
 0x417   : > { %v2289_v1 = vadd.f32 %v2288_v63, %v2287_v62  ;;  %v2290_v36 = vpop.f32.mrb[6].mxu0 }
 0x418   : > { %v2291_v7 = vpop.f32.mrb[7].mxu0 }
 0x419   : > { %v2292_v9 = vadd.f32 %v2291_v7, %v2290_v36  ;;  %1394 = vrot.lane.b32.xlu1 %v2289_v1, %s2416_s14  ;;  %v2974_v12 = vmul.f32 %v2289_v1, %v2230_v8 }
 0x41b   : > { %1396 = vrot.lane.b32.xlu0 %v2292_v9, %s2416_s14  ;;  %v2976_v13 = vmul.f32 %v2292_v9, %v2230_v8  ;;  %s3330_s14 = smov 17  }
 0x41d   : > { %1409 = vrot.lane.b32.xlu1 %v2289_v1, %s2417_s25  ;;  %v1467_v14 = vpack.c.bf16 %v2976_v13, %v2974_v12  ;;  %v2238_v12 = vld [vmem:[%s3310_s12 + $0x8] ss:$0 sm:$0xff] }
 0x41f   : > { %1411 = vrot.lane.b32.xlu0 %v2292_v9, %s2417_s25  ;;  %s3331_s25 = smov 16  }
 0x421   : > { %1425 = vrot.lane.b32.xlu1 %v2289_v1, %s2418_s20 }
 0x423   : > { %1427 = vrot.lane.b32.xlu0 %v2292_v9, %s2418_s20  ;;  %s3333_s20 = smov 1  }
 0x425   : > { %1441 = vrot.lane.b32.xlu1 %v2289_v1, %s3326_s19 }
 0x427   : > { %1443 = vrot.lane.b32.xlu0 %v2292_v9, %s3326_s19  ;;  %s3335_s19 = smov 111  }
 0x429   : > { %1469 = vrot.lane.b32.xlu1 %v2289_v1, %s3329_s17 }
 0x42b   : > { %1471 = vrot.lane.b32.xlu0 %v2292_v9, %s3329_s17 }
 0x42d   : > { %1485 = vrot.lane.b32.xlu1 %v2289_v1, %s2419_s18 }
 0x42f   : > { %1487 = vrot.lane.b32.xlu0 %v2292_v9, %s2419_s18  ;;  %s3334_s18 = smov 113  }
 0x431   : > { %1501 = vrot.lane.b32.xlu1 %v2289_v1, %s2420_s23 }
 0x433   : > { %1503 = vrot.lane.b32.xlu0 %v2292_v9, %s2420_s23 }
 0x435   : > { %1517 = vrot.lane.b32.xlu1 %v2289_v1, %s2421_s22  ;;  %v2236_v1 = vld [vmem:[%s3310_s12 + $0x7] ss:$0 sm:$0xff] }
 0x437   : > { %1519 = vrot.lane.b32.xlu0 %v2292_v9, %s2421_s22 }
 0x439   : > { %1548 = vperm.xlu1 %2333, %v1544_v21  }
 0x43b   : > { %1553 = vperm.xlu0 %2332, %v1545_v23  }
 0x48b   : > { %v1395_v43 = vpop.permute.xlu1 %1394 }
 0x48c   : > { %v1405_v39 = vmul.f32 %v2222_v31, %v1395_v43 }
 0x48d   : > { %v1397_v44 = vpop.permute.xlu0 %1396 }
 0x48e   : > { %v1406_v45 = vmul.f32 %v2222_v31, %v1397_v44 }
 0x48f   : > { %v1410_v32 = vpop.permute.xlu1 %1409 }
 0x490   : > { %v1407_v47 = vpack.c.bf16 %v1406_v45, %v1405_v39  ;;  %v1421_v41 = vmul.f32 %v2224_v46, %v1410_v32  ;;  %v2261_v39 = vld [vmem:[%s3309_s11 + $0x8] sm:$0x3] }
 0x491   : > { %v1412_v48 = vpop.permute.xlu0 %1411  ;;  %v1884_v45 = vrot.slane %v2261_v39, %v2541_v11  ;;  %v1888_v32 = vrot.slane %v2261_v39, %v2539_v10 }
 0x492   : > { %v1422_v49 = vmul.f32 %v2224_v46, %v1412_v48  ;;  %1569 = vmatpush1.bf16.msra.mxu1 %v1407_v47 }
 0x493   : > { %v1426_v51 = vpop.permute.xlu1 %1425  ;;  %1570 = vmatprep.subr.bf16.mxu1 %v2415_v22 }
 0x494   : > { %v1423_v52 = vpack.c.bf16 %v1422_v49, %v1421_v41  ;;  %v1437_v15 = vmul.f32 %v2226_v50, %v1426_v51 }
 0x495   : > { %v1428_v33 = vpop.permute.xlu0 %1427 }
 0x496   : > { %v1438_v16 = vmul.f32 %v2226_v50, %v1428_v33  ;;  %1571 = vmatpush1.bf16.msra.mxu1 %v1423_v52 }
 0x497   : > { %v1442_v19 = vpop.permute.xlu1 %1441  ;;  %1572 = vmatprep.subr.bf16.mxu1 %v2415_v22 }
 0x498   : > { %v1439_v54 = vpack.c.bf16 %v1438_v16, %v1437_v15  ;;  %v1453_v55 = vmul.f32 %v2228_v53, %v1442_v19  ;;  %v3128_v16 = vld.sshfl [vmem:[%s3305_s7] sm:$0x33 pattern:$0x76325410] }
 0x499   : > { %v1444_v34 = vpop.permute.xlu0 %1443  ;;  %v2046_v19 = vld [vmem:[%s3306_s8] sm:$0xf] }
 0x49a   : > { %v1454_v56 = vmul.f32 %v2228_v53, %v1444_v34  ;;  %1573 = vmatpush1.bf16.msra.mxu1 %v1439_v54  ;;  %v2060_v53 = vcombine.high %v3128_v16, %v3128_v16 }
 0x49b   : > { %v1470_v57 = vpop.permute.xlu1 %1469  ;;  %1574 = vmatprep.subr.bf16.mxu1 %v2415_v22 }
 0x49c   : > { %v1455_v58 = vpack.c.bf16 %v1454_v56, %v1453_v55  ;;  %v1481_v3 = vmul.f32 %v2232_v60, %v1470_v57 }
 0x49d   : > { %v1472_v59 = vpop.permute.xlu0 %1471 }
 0x49e   : > { %1575 = vmatpush1.bf16.msra.mxu1 %v1455_v58  ;;  %v1482_v18 = vmul.f32 %v2232_v60, %v1472_v59 }
 0x49f   : > { %v1486_v17 = vpop.permute.xlu1 %1485  ;;  %1576 = vmatprep.subr.bf16.mxu1 %v2415_v22 }
 0x4a0   : > { %v1483_v4 = vpack.c.bf16 %v1482_v18, %v1481_v3  ;;  %v1497_v63 = vmul.f32 %v2234_v35, %v1486_v17 }
 0x4a1   : > { %v1488_v2 = vpop.permute.xlu0 %1487 }
 0x4a2   : > { %1577 = vmatpush1.bf16.msra.mxu1 %v1467_v14  ;;  %v1498_v5 = vmul.f32 %v2234_v35, %v1488_v2 }
 0x4a3   : > { %1578 = vmatprep.subr.bf16.mxu1 %v2415_v22  ;;  %v1502_v6 = vpop.permute.xlu1 %1501 }
 0x4a4   : > { %v1499_v36 = vpack.c.bf16 %v1498_v5, %v1497_v63  ;;  %v1513_v9 = vmul.f32 %v2236_v1, %v1502_v6 }
 0x4a5   : > { %v1504_v62 = vpop.permute.xlu0 %1503 }
 0x4a6   : > { %1579 = vmatpush1.bf16.msra.mxu1 %v1483_v4  ;;  %v1514_v7 = vmul.f32 %v2236_v1, %v1504_v62  ;;  %v1763_v4 = vld [vmem:[%s3309_s11] sm:$0x3]  ;;  %v2258_v1 = vld [vmem:[%s3309_s11 + $0x2] sm:$0x3] }
 0x4a7   : > { %1580 = vmatprep.subr.bf16.mxu1 %v2415_v22  ;;  %v1518_v13 = vpop.permute.xlu1 %1517  ;;  %v1768_v6 = vrot.slane %v1763_v4, %v2541_v11  ;;  %v1772_v62 = vrot.slane %v1763_v4, %v2539_v10 }
 0x4a8   : > { %v1515_v14 = vpack.c.bf16 %v1514_v7, %v1513_v9  ;;  %v1529_v21 = vmul.f32 %v2238_v12, %v1518_v13  ;;  %v1800_v13 = vrot.slane %v2258_v1, %v2541_v11 }
 0x4a9   : > { %v1520_v8 = vpop.permute.xlu0 %1519 }
 0x4aa   : > { %1581 = vmatpush1.bf16.msra.mxu1 %v1499_v36  ;;  %v1530_v37 = vmul.f32 %v2238_v12, %v1520_v8 }
 0x4ab   : > { %1582 = vmatprep.subr.bf16.mxu1 %v2415_v22 }
 0x4ac   : > { %v1531_v23 = vpack.c.bf16 %v1530_v37, %v1529_v21 }
 0x4ae   : > { %1583 = vmatpush1.bf16.msra.mxu1 %v1515_v14  ;;  %v1804_v14 = vrot.slane %v2258_v1, %v2539_v10 }
 0x4af   : > { %1584 = vmatprep.subr.bf16.mxu1 %v2415_v22  ;;  %v2382_v22 = vld [vmem:[%s3308_s10 + $0x74] ss:$8 sps:$4 sm:$0xff]  }
 0x4b0   : > { %1722 = vmatprep.subr.bf16.mxu0 %v2382_v22 }
 0x4b1   : > { %1723 = vmatpush1.bf16.msra.mxu0 %v2380_v24 }
 0x4b2   : > { %1585 = vmatpush1.bf16.msra.mxu1 %v1531_v23 }
 0x4b5   : > { %1601 = vmatmul.mubr.bf16.vlgmr.msra.gmra.mrb[4].mxu1 %v2358_v20 }
 0x4b6   : > { %2267 = vmatprep.mubr.msk.bf16.mxu1 %vm809_vm0, %v2060_v53 }
 0x4b8   : > { %v1549_v38 = vpop.permute.xlu1 %1548 }
 0x4ba   : > { %v1554_v29 = vpop.permute.xlu0 %1553 }
 0x588   : > { %v1602_v26 = vpop.f32.mrb[4].mxu1 }
 0x589   : > { %v1603_v27 = vadd.f32 %v1602_v26, %v1549_v38  ;;  %v1604_v28 = vpop.f32.mrb[5].mxu1 }
 0x58a   : > { %v1605_v30 = vpop.f32.mrb[6].mxu1 }
 0x58b   : > { %v1606_v40 = vadd.f32 %v1605_v30, %v1554_v29  ;;  %v1607_v42 = vpop.f32.mrb[7].mxu1  ;;  %v1609_v31 = vmax.f32 %v1603_v27, 0.0  ;;  %v1832_v30 = vrot.slane %v2259_v0, %v2541_v11 }
 0x58d   : > { %v1610_v43 = vmax.f32 %v1606_v40, 0.0  ;;  %v1836_v40 = vrot.slane %v2259_v0, %v2539_v10 }
 0x58f   : > { %v1611_v44 = vpack.c.bf16 %v1610_v43, %v1609_v31 }
 0x591   : > { %1741 = vmatmul.mubr.bf16.vlgmr.msra.gmra.mrb[8].mxu0 %v1611_v44 }
 0x664   : > { %v1742_v46 = vpop.f32.mrb[8].mxu0 }
 0x665   : > { %1751 = vrot.lane.b32.xlu1 %v1742_v46, %s3330_s14  ;;  %v1744_v47 = vpop.f32.mrb[9].mxu0  ;;  %v3087_v49 = vmul.f32 %v1884_v45, %v1742_v46 }
 0x666   : > { %v1746_v48 = vpop.f32.mrb[10].mxu0  ;;  %v3091_v51 = vmul.f32 %v1888_v32, %v1744_v47 }
 0x667   : > { %1753 = vrot.lane.b32.xlu0 %v1746_v48, %s3330_s14  ;;  %v1748_v41 = vpop.f32.mrb[11].mxu0  ;;  %v3089_v50 = vmul.f32 %v1884_v45, %v1746_v48  ;;  %v2260_v45 = vld [vmem:[%s3309_s11 + $0x6] sm:$0x3] }
 0x668   : > { %v3093_v52 = vmul.f32 %v1888_v32, %v1748_v41 }
 0x669   : > { %1783 = vrot.lane.b32.xlu1 %v1742_v46, %s3331_s25  ;;  %v1895_v33 = vpack.c.bf16 %v3089_v50, %v3087_v49 }
 0x66a   : > { %v1896_v15 = vpack.c.bf16 %v3093_v52, %v3091_v51  ;;  %v2264_v51 = vld [vmem:[%s3309_s11 + $0xe] sm:$0x3] }
 0x66b   : > { %1785 = vrot.lane.b32.xlu0 %v1746_v48, %s3331_s25 }
 0x66d   : > { %1815 = vrot.lane.b32.xlu1 %v1742_v46, %s3332_s30 }
 0x66f   : > { %1817 = vrot.lane.b32.xlu0 %v1746_v48, %s3332_s30 }
 0x671   : > { %1847 = vrot.lane.b32.xlu1 %v1742_v46, %s3333_s20 }
 0x673   : > { %1849 = vrot.lane.b32.xlu0 %v1746_v48, %s3333_s20 }
 0x675   : > { %1899 = vrot.lane.b32.xlu1 %v1742_v46, %s3329_s17 }
 0x677   : > { %1901 = vrot.lane.b32.xlu0 %v1746_v48, %s3329_s17 }
 0x679   : > { %1931 = vrot.lane.b32.xlu1 %v1742_v46, %s3334_s18 }
 0x67b   : > { %1933 = vrot.lane.b32.xlu0 %v1746_v48, %s3334_s18 }
 0x67d   : > { %1963 = vrot.lane.b32.xlu1 %v1742_v46, %s3328_s28 }
 0x67f   : > { %1965 = vrot.lane.b32.xlu0 %v1746_v48, %s3328_s28 }
 0x681   : > { %1755 = vrot.lane.b32.xlu1 %v1744_v47, %s3330_s14 }
 0x683   : > { %1757 = vrot.lane.b32.xlu0 %v1748_v41, %s3330_s14  ;;  %s3336_s14 = sadd.s32 4294967295, %s2405_s27  }
 0x685   : > { %1787 = vrot.lane.b32.xlu1 %v1744_v47, %s3331_s25 }
 0x687   : > { %1789 = vrot.lane.b32.xlu0 %v1748_v41, %s3331_s25  ;;  %s2182_s25 = sshll.u32 %s3336_s14, 1 }
 0x688   : > { %p464_p8 = scmp.lt.s32.totalorder %s2182_s25, 3 }
 0x689   : > { %1819 = vrot.lane.b32.xlu1 %v1744_v47, %s3332_s30 }
 0x68a   : > { %s3341_s25 = smov (!%p464_p8, %s2182_s25), 3 }
 0x68b   : > { %1821 = vrot.lane.b32.xlu0 %v1748_v41, %s3332_s30  ;;  %s2183_s30 = sshll.u32 %s3341_s25, 2 }
 0x68d   : > { %1851 = vrot.lane.b32.xlu1 %v1744_v47, %s3333_s20 }
 0x68f   : > { %1853 = vrot.lane.b32.xlu0 %v1748_v41, %s3333_s20 }
 0x691   : > { %1995 = vrot.lane.b32.xlu1 %v1742_v46, %s3335_s19 }
 0x693   : > { %1997 = vrot.lane.b32.xlu0 %v1746_v48, %s3335_s19 }
 0x695   : > { %1903 = vrot.lane.b32.xlu1 %v1744_v47, %s3329_s17 }
 0x697   : > { %1905 = vrot.lane.b32.xlu0 %v1748_v41, %s3329_s17 }
 0x699   : > { %1935 = vrot.lane.b32.xlu1 %v1744_v47, %s3334_s18 }
 0x69b   : > { %1937 = vrot.lane.b32.xlu0 %v1748_v41, %s3334_s18 }
 0x69d   : > { %1967 = vrot.lane.b32.xlu1 %v1744_v47, %s3328_s28 }
 0x69f   : > { %1969 = vrot.lane.b32.xlu0 %v1748_v41, %s3328_s28 }
 0x6a1   : > { %1999 = vrot.lane.b32.xlu1 %v1744_v47, %s3335_s19 }
 0x6a3   : > { %2001 = vrot.lane.b32.xlu0 %v1748_v41, %s3335_s19  ;;  %s467_s19 = scalar_lea.vmem %s3311_s13, %s2183_s30 }
 0x6a5   : > { %2049 = vperm.xlu1 %2333, %v2046_v19  }
 0x6d7   : > { %v1752_v54 = vpop.permute.xlu1 %1751 }
 0x6d9   : > { %v1754_v34 = vpop.permute.xlu0 %1753 }
 0x6db   : > { %v1784_v55 = vpop.permute.xlu1 %1783 }
 0x6dd   : > { %v1786_v56 = vpop.permute.xlu0 %1785 }
 0x6df   : > { %v1816_v57 = vpop.permute.xlu1 %1815 }
 0x6e1   : > { %v1818_v58 = vpop.permute.xlu0 %1817 }
 0x6e3   : > { %v1848_v59 = vpop.permute.xlu1 %1847 }
 0x6e5   : > { %v3140_v60 = vpop.permute.xlu0 %1849 }
 0x6e7   : > { %v3142_v17 = vpop.permute.xlu1 %1899 }
 0x6e9   : > { %v3144_v18 = vpop.permute.xlu0 %1901 }
 0x6eb   : > { %v3146_v2 = vpop.permute.xlu1 %1931 }
 0x6ed   : > { %v3148_v3 = vpop.permute.xlu0 %1933 }
 0x6ef   : > { %v3150_v35 = vpop.permute.xlu1 %1963 }
 0x6f1   : > { %v3155_v5 = vpop.permute.xlu0 %1965 }
 0x6f3   : > { %v1756_v63 = vpop.permute.xlu1 %1755 }
 0x6f4   : > { %v1759_v36 = vsel %vm484_vm1, %v1752_v54, %v1756_v63  ;;  %v1761_v7 = vsel %vm484_vm1, %v1756_v63, %v1752_v54  ;;  %v1864_v54 = vrot.slane %v2260_v45, %v2541_v11 }
 0x6f5   : > { %v1758_v8 = vpop.permute.xlu0 %1757  ;;  %v1775_v37 = vmul.f32 %v1768_v6, %v1761_v7  ;;  %v1776_v21 = vmul.f32 %v1772_v62, %v1759_v36 }
 0x6f6   : > { %v1760_v9 = vsel %vm484_vm1, %v1754_v34, %v1758_v8  ;;  %v1762_v12 = vsel %vm484_vm1, %v1758_v8, %v1754_v34  ;;  %v1868_v34 = vrot.slane %v2260_v45, %v2539_v10 }
 0x6f7   : > { %v1777_v23 = vmul.f32 %v1768_v6, %v1762_v12  ;;  %v1778_v20 = vmul.f32 %v1772_v62, %v1760_v9  ;;  %v1788_v61 = vpop.permute.xlu1 %1787 }
 0x6f8   : > { %v1791_v22 = vsel %vm517_vm2, %v1784_v55, %v1788_v61  ;;  %v1793_v24 = vsel %vm517_vm2, %v1788_v61, %v1784_v55 }
 0x6f9   : > { %v1779_v38 = vpack.c.bf16 %v1777_v23, %v1775_v37  ;;  %v1790_v26 = vpop.permute.xlu0 %1789  ;;  %v1780_v27 = vpack.c.bf16 %v1778_v20, %v1776_v21  ;;  %v1807_v42 = vmul.f32 %v1800_v13, %v1793_v24  ;;  %v1808_v31 = vmul.f32 %v1804_v14, %v1791_v22  ;;  %v2263_v22 = vld [vmem:[%s3309_s11 + $0xc] sm:$0x3] }
 0x6fa   : > { %v1792_v28 = vsel %vm517_vm2, %v1786_v56, %v1790_v26  ;;  %v1794_v29 = vsel %vm517_vm2, %v1790_v26, %v1786_v56 }
 0x6fb   : > { %v1809_v43 = vmul.f32 %v1800_v13, %v1794_v29  ;;  %v1810_v44 = vmul.f32 %v1804_v14, %v1792_v28  ;;  %v1820_v39 = vpop.permute.xlu1 %1819  ;;  %2065 = vmatprep.subr.bf16.mxu1 %v1780_v27  ;;  %v1948_v29 = vrot.slane %v2263_v22, %v2541_v11 }
 0x6fc   : > { %v1823_v46 = vsel %vm551_vm3, %v1816_v57, %v1820_v39  ;;  %v1825_v32 = vsel %vm551_vm3, %v1820_v39, %v1816_v57  ;;  %2066 = vmatpush1.bf16.msra.mxu1 %v1779_v38 }
 0x6fd   : > { %v1811_v47 = vpack.c.bf16 %v1809_v43, %v1807_v42  ;;  %v1822_v48 = vpop.permute.xlu0 %1821  ;;  %v1812_v41 = vpack.c.bf16 %v1810_v44, %v1808_v31  ;;  %v1839_v55 = vmul.f32 %v1832_v30, %v1825_v32  ;;  %v1840_v56 = vmul.f32 %v1836_v40, %v1823_v46 }
 0x6fe   : > { %v1824_v53 = vsel %vm551_vm3, %v1818_v58, %v1822_v48  ;;  %v1826_v19 = vsel %vm551_vm3, %v1822_v48, %v1818_v58  ;;  %v1980_v32 = vrot.slane %v2264_v51, %v2541_v11 }
 0x6ff   : > { %v1841_v4 = vmul.f32 %v1832_v30, %v1826_v19  ;;  %v1842_v6 = vmul.f32 %v1836_v40, %v1824_v53  ;;  %v1852_v62 = vpop.permute.xlu1 %1851  ;;  %2067 = vmatprep.subr.bf16.mxu1 %v1812_v41  ;;  %v1952_v30 = vrot.slane %v2263_v22, %v2539_v10 }
 0x700   : > { %v1855_v57 = vsel %vm585_vm4, %v1848_v59, %v1852_v62  ;;  %v1857_v63 = vsel %vm585_vm4, %v1852_v62, %v1848_v59  ;;  %2068 = vmatpush1.bf16.msra.mxu1 %v1811_v47  ;;  %v2262_v59 = vld [vmem:[%s3309_s11 + $0xa] sm:$0x3]  ;;  %v1984_v47 = vrot.slane %v2264_v51, %v2539_v10 }
 0x701   : > { %v1843_v1 = vpack.c.bf16 %v1841_v4, %v1839_v55  ;;  %v1854_v36 = vpop.permute.xlu0 %1853  ;;  %v1844_v58 = vpack.c.bf16 %v1842_v6, %v1840_v56  ;;  %v1871_v9 = vmul.f32 %v1864_v54, %v1857_v63  ;;  %v1872_v12 = vmul.f32 %v1868_v34, %v1855_v57 }
 0x702   : > { %v1856_v7 = vsel %vm585_vm4, %v3140_v60, %v1854_v36  ;;  %v1858_v8 = vsel %vm585_vm4, %v1854_v36, %v3140_v60  ;;  %v1916_v61 = vrot.slane %v2262_v59, %v2541_v11  ;;  %v1920_v0 = vrot.slane %v2262_v59, %v2539_v10 }
 0x703   : > { %v1873_v13 = vmul.f32 %v1864_v54, %v1858_v8  ;;  %v1874_v14 = vmul.f32 %v1868_v34, %v1856_v7  ;;  %v1996_v37 = vpop.permute.xlu1 %1995  ;;  %2069 = vmatprep.subr.bf16.mxu1 %v1844_v58 }
 0x704   : > { %2070 = vmatpush1.bf16.msra.mxu1 %v1843_v1 }
 0x705   : > { %v1875_v21 = vpack.c.bf16 %v1873_v13, %v1871_v9  ;;  %v3211_v23 = vpop.permute.xlu0 %1997  ;;  %v1876_v20 = vpack.c.bf16 %v1874_v14, %v1872_v12 }
 0x707   : > { %v1904_v60 = vpop.permute.xlu1 %1903  ;;  %2071 = vmatprep.subr.bf16.mxu1 %v1876_v20 }
 0x708   : > { %v1907_v24 = vsel %vm640_vm5, %v3142_v17, %v1904_v60  ;;  %v1909_v38 = vsel %vm640_vm5, %v1904_v60, %v3142_v17  ;;  %2072 = vmatpush1.bf16.msra.mxu1 %v1875_v21 }
 0x709   : > { %v1906_v26 = vpop.permute.xlu0 %1905  ;;  %2073 = vmatprep.subr.bf16.mxu1 %v1896_v15  ;;  %v1923_v40 = vmul.f32 %v1916_v61, %v1907_v24  ;;  %v1924_v17 = vmul.f32 %v1920_v0, %v1909_v38 }
 0x70a   : > { %v1908_v27 = vsel %vm640_vm5, %v3144_v18, %v1906_v26  ;;  %v1910_v28 = vsel %vm640_vm5, %v1906_v26, %v3144_v18 }
 0x70b   : > { %v1925_v42 = vmul.f32 %v1916_v61, %v1908_v27  ;;  %v1926_v31 = vmul.f32 %v1920_v0, %v1910_v28  ;;  %v1936_v43 = vpop.permute.xlu1 %1935 }
 0x70c   : > { %v1939_v52 = vsel %vm674_vm6, %v3146_v2, %v1936_v43  ;;  %v1941_v15 = vsel %vm674_vm6, %v1936_v43, %v3146_v2  ;;  %2074 = vmatpush1.bf16.msra.mxu1 %v1895_v33  ;;  %v2265_v33 = vld [vmem:[%s3309_s11 + $0x10] sm:$0x3] }
 0x70d   : > { %v1927_v18 = vpack.c.bf16 %v1925_v42, %v1923_v40  ;;  %v1938_v44 = vpop.permute.xlu0 %1937  ;;  %v1928_v39 = vpack.c.bf16 %v1926_v31, %v1924_v17  ;;  %v1955_v2 = vmul.f32 %v1948_v29, %v1939_v52  ;;  %v1956_v48 = vmul.f32 %v1952_v30, %v1941_v15 }
 0x70e   : > { %v1940_v45 = vsel %vm674_vm6, %v3148_v3, %v1938_v44  ;;  %v1942_v46 = vsel %vm674_vm6, %v1938_v44, %v3148_v3  ;;  %v2012_v4 = vrot.slane %v2265_v33, %v2541_v11  ;;  %v2016_v6 = vrot.slane %v2265_v33, %v2539_v10 }
 0x70f   : > { %v1957_v41 = vmul.f32 %v1948_v29, %v1940_v45  ;;  %v1958_v49 = vmul.f32 %v1952_v30, %v1942_v46  ;;  %v1968_v50 = vpop.permute.xlu1 %1967  ;;  %2075 = vmatprep.subr.bf16.mxu1 %v1928_v39 }
 0x710   : > { %v1971_v53 = vsel %vm708_vm7, %v3150_v35, %v1968_v50  ;;  %v1973_v3 = vsel %vm708_vm7, %v1968_v50, %v3150_v35  ;;  %2076 = vmatpush1.bf16.msra.mxu1 %v1927_v18 }
 0x711   : > { %v1959_v19 = vpack.c.bf16 %v1957_v41, %v1955_v2  ;;  %v1970_v54 = vpop.permute.xlu0 %1969  ;;  %v1960_v34 = vpack.c.bf16 %v1958_v49, %v1956_v48  ;;  %v1987_v62 = vmul.f32 %v1980_v32, %v1971_v53  ;;  %v1988_v57 = vmul.f32 %v1984_v47, %v1973_v3 }
 0x712   : > { %v1972_v55 = vsel %vm708_vm7, %v3155_v5, %v1970_v54  ;;  %v1974_v56 = vsel %vm708_vm7, %v1970_v54, %v3155_v5 }
 0x713   : > { %v1989_v63 = vmul.f32 %v1980_v32, %v1972_v55  ;;  %v1990_v35 = vmul.f32 %v1984_v47, %v1974_v56  ;;  %v2000_v1 = vpop.permute.xlu1 %1999  ;;  %2077 = vmatprep.subr.bf16.mxu1 %v1960_v34 }
 0x714   : > { %v2003_v36 = vsel %vm742_vm8, %v1996_v37, %v2000_v1  ;;  %v2005_v58 = vsel %vm742_vm8, %v2000_v1, %v1996_v37  ;;  %2078 = vmatpush1.bf16.msra.mxu1 %v1959_v19 }
 0x715   : > { %v1991_v7 = vpack.c.bf16 %v1989_v63, %v1987_v62  ;;  %v2002_v5 = vpop.permute.xlu0 %2001  ;;  %v1992_v8 = vpack.c.bf16 %v1990_v35, %v1988_v57  ;;  %v2019_v9 = vmul.f32 %v2012_v4, %v2003_v36  ;;  %v2020_v12 = vmul.f32 %v2016_v6, %v2005_v58 }
 0x716   : > { %v2004_v10 = vsel %vm742_vm8, %v3211_v23, %v2002_v5  ;;  %v2006_v11 = vsel %vm742_vm8, %v2002_v5, %v3211_v23 }
 0x717   : > { %v2021_v13 = vmul.f32 %v2012_v4, %v2004_v10  ;;  %v2022_v14 = vmul.f32 %v2016_v6, %v2006_v11  ;;  %2079 = vmatprep.subr.bf16.mxu1 %v1992_v8 }
 0x718   : > { %2080 = vmatpush1.bf16.msra.mxu1 %v1991_v7 }
 0x719   : > { %v2023_v37 = vpack.c.bf16 %v2021_v13, %v2019_v9  ;;  %v2024_v59 = vpack.c.bf16 %v2022_v14, %v2020_v12 }
 0x71b   : > { %2081 = vmatprep.subr.bf16.mxu1 %v2024_v59 }
 0x71c   : > { %2082 = vmatpush1.bf16.msra.mxu1 %v2023_v37 }
 0x71f   : > { %2098 = vmatmul.mubr.bf16.vlgmr.msra.gmra.mrb[8].mxu1 %v3128_v16 }
 0x724   : > { %v2050_v21 = vpop.permute.xlu1 %2049 }
 0x7f2   : > { %v2099_v20 = vpop.f32.mrb[8].mxu1 }
 0x7f3   : > { %v2100_v25 = vadd.f32 %v2099_v20, %v2050_v21  ;;  %v2101_v23 = vpop.f32.mrb[9].mxu1 }
 0x7f4   : > { %v2102_v61 = vadd.f32 %v2101_v23, %v2050_v21  ;;  %v2103_v0 = vpop.f32.mrb[10].mxu1 }
 0x7f5   : > { %v2104_v60 = vpop.f32.mrb[11].mxu1 }
 0x7f6   : > { %v2108_v22 = vcombine.low %v2100_v25, %v2102_v61 }
 0x7f8   : > { %2110 = vst [vmem:[%s467_s19] sm:$0xff] %v2108_v22 }
 0x7f9 PF: > { %p20_p9 = scmp.ge.s32.totalorder %s2509_s29, 4   ;;  %s3337_s25 = smov %s2401_s26 }
 0x7fa   : > { %s3338_s26 = smov %s2518_s15  ;;  %s3339_s27 = smov %s2509_s29 }
 0x7fb   :  { %22 = sbr.rel (!%p20_p9) target bundleno = 2 (0x2), region = 146 }

</bundles_post_ra>
